<compile_context>
chip_gen: v5e
topology: v5e:2x2
jax: 0.10.0
libtpu: 0.0.40
codegen_flags: <defaults>
</compile_context>

<pallas_src>
import jax
import jax.numpy as jnp
import numpy as np
from jax.experimental import pallas as pl
from jax.experimental.pallas import tpu as pltpu


def _lstm_sum_kernel(x_ref, wih0_ref, wih12_ref, whh_ref, b_ref, out_ref):
    """Full stacked-LSTM recurrence + relu-sum in one kernel invocation.

    x_ref     : (B, T)        input sequence (feature dim == 1 folded away)
    wih0_ref  : (1, 4H)       layer-0 input weights (i/f/o columns pre-scaled 0.5)
    wih12_ref : (2, H, 4H)    layer-1/2 input weights (pre-scaled)
    whh_ref   : (3, H, 4H)    per-layer hidden weights (pre-scaled)
    b_ref     : (3, 1, 4H)    per-layer combined bias b_ih + b_hh (pre-scaled)
    out_ref   : (B, H)        relu-sum over time of last-layer outputs
    """
    B, T = x_ref.shape
    H = out_ref.shape[1]
    H2, H3 = 2 * H, 3 * H

    # Hoist all loads / weight reads out of the time loop.
    x_all = x_ref[...]                                  # (B, T)
    wih0 = wih0_ref[...]                                # (1, 4H)
    wih = [None, wih12_ref[0], wih12_ref[1]]            # (H, 4H) each
    whh = [whh_ref[0], whh_ref[1], whh_ref[2]]          # (H, 4H) each
    b = [b_ref[0], b_ref[1], b_ref[2]]                  # (1, 4H) each

    # Layer-0 input + bias contribution for every timestep, computed off the
    # recurrent dependency chain (input dim == 1 -> broadcast scale, no MXU).
    xg0 = [x_all[:, t:t + 1] * wih0 + b[0] for t in range(T)]   # (B, 4H) each

    zeros = jnp.zeros((B, H), jnp.float32)
    h = [zeros, zeros, zeros]
    c = [zeros, zeros, zeros]
    acc = zeros

    def cell(gates, c_prev):
        # One wide tanh (single EUP push). Because the i/f/o columns of the
        # weights & biases were pre-scaled by 0.5 in the wrapper,
        # sigmoid(z) == 0.5 * tanh(z / 2) + 0.5 comes out of the same push.
        t_all = jnp.tanh(gates)                         # (B, 4H)
        i_g = 0.5 * t_all[:, 0:H] + 0.5                 # lane offset 0: no rotate
        f_g = 0.5 * t_all[:, H:H2] + 0.5
        g_a = t_all[:, H2:H3]
        o_g = 0.5 * t_all[:, H3:] + 0.5                 # off the c_new path
        c_new = f_g * c_prev + i_g * g_a
        h_new = o_g * jnp.tanh(c_new)
        return h_new, c_new

    # T is tiny (== input_dim): static, fully unrolled. If T grows beyond
    # ~16-32, switch to lax.fori_loop with modest unroll to bound live ranges.
    for t in range(T):
        # Layer 0: only the hidden matmul is on the chain.
        gates0 = xg0[t] + jnp.dot(h[0], whh[0],
                                  preferred_element_type=jnp.float32)
        h[0], c[0] = cell(gates0, c[0])

        # Layers 1, 2: two independent dots (no per-step concat on the chain);
        # they overlap in the MXU pipeline.
        for layer in (1, 2):
            gates = (jnp.dot(h[layer - 1], wih[layer],
                             preferred_element_type=jnp.float32)
                     + jnp.dot(h[layer], whh[layer],
                               preferred_element_type=jnp.float32)
                     + b[layer])
            h[layer], c[layer] = cell(gates, c[layer])

        acc = acc + jnp.maximum(h[2], 0.0)

    out_ref[...] = acc.astype(out_ref.dtype)


def _gate_scale(H, dtype=jnp.float32):
    """0.5 for i/f/o gate columns, 1.0 for g (PyTorch gate order i,f,g,o)."""
    return jnp.concatenate([jnp.full((2 * H,), 0.5, dtype),
                            jnp.ones((H,), dtype),
                            jnp.full((H,), 0.5, dtype)])


def _prep_weight(w, H):
    """w: (4H, in_dim) PyTorch layout -> (in_dim, 4H), i/f/o columns * 0.5."""
    return w.T * _gate_scale(H, w.dtype)[None, :]


def layout_extractor_forward(x2d, params, hidden_dim):
    """x2d: (B, input_dim) float32 -> (B, hidden_dim) float32.

    Note (perf): the kernel is latency-bound at tiny B; the wrapper supports
    any batch size — batch many sequences together (B >= 8, ideally >= 128)
    for essentially free throughput. At larger B, add a leading grid axis with
    dimension_semantics=("parallel",) to shard across v7x's two TensorCores.
    """
    B, T = x2d.shape
    H = hidden_dim
    wih_l, whh_l, bih_l, bhh_l = params

    # Layer 0 input weights (in_dim == 1): (1, 4H), pre-scaled.
    wih0 = _prep_weight(wih_l[0], H)                                # (1, 4H)
    # Layer 1/2 input weights and all hidden weights, pre-scaled.
    wih12 = jnp.stack([_prep_weight(wih_l[l], H) for l in (1, 2)])  # (2, H, 4H)
    whh_all = jnp.stack([_prep_weight(whh_l[l], H) for l in range(3)])  # (3, H, 4H)
    # Combined biases, pre-scaled.
    b_all = jnp.stack([
        ((bih_l[l] + bhh_l[l]) * _gate_scale(H)).reshape(1, 4 * H)
        for l in range(3)
    ])                                                              # (3, 1, 4H)

    x_bt = x2d.astype(jnp.float32)                                  # (B, T)

    vmem = lambda: pl.BlockSpec(memory_space=pltpu.MemorySpace.VMEM)
    # No grid: the whole ~100 KB working set lives in VMEM, single invocation
    # (avoids ~0.35 us per-step pipeline overhead that would swamp the compute).
    return pl.pallas_call(
        _lstm_sum_kernel,
        out_shape=jax.ShapeDtypeStruct((B, H), jnp.float32),
        in_specs=[vmem() for _ in range(5)],
        out_specs=vmem(),
    )(x_bt, wih0, wih12, whh_all, b_all)


def init_lstm_params(key, hidden_dim, n_layers=3):
    """PyTorch-style uniform(-1/sqrt(H), 1/sqrt(H)) init, deterministic."""
    H = hidden_dim
    bound = 1.0 / np.sqrt(H)
    wih, whh, bih, bhh = [], [], [], []
    for l in range(n_layers):
        in_dim = 1 if l == 0 else H
        key, k1, k2, k3, k4 = jax.random.split(key, 5)
        wih.append(jax.random.uniform(k1, (4 * H, in_dim), jnp.float32, -bound, bound))
        whh.append(jax.random.uniform(k2, (4 * H, H), jnp.float32, -bound, bound))
        bih.append(jax.random.uniform(k3, (4 * H,), jnp.float32, -bound, bound))
        bhh.append(jax.random.uniform(k4, (4 * H,), jnp.float32, -bound, bound))
    return wih, whh, bih, bhh


def ref_forward(x2d, params, hidden_dim):
    """Pure-JAX reference mirroring torch.nn.LSTM semantics (PyTorch gate order)."""
    wih, whh, bih, bhh = params
    H = hidden_dim
    B, T = x2d.shape
    x = x2d.reshape(B, T, 1).astype(jnp.float32)
    hi = jax.lax.Precision.HIGHEST
    h = [jnp.zeros((B, H), jnp.float32) for _ in range(3)]
    c = [jnp.zeros((B, H), jnp.float32) for _ in range(3)]
    acc = jnp.zeros((B, H), jnp.float32)
    for t in range(T):
        inp = x[:, t, :]
        for l in range(3):
            gates = (jnp.dot(inp, wih[l].T, precision=hi) + bih[l]
                     + jnp.dot(h[l], whh[l].T, precision=hi) + bhh[l])
            i = jax.nn.sigmoid(gates[:, 0 * H:1 * H])
            f = jax.nn.sigmoid(gates[:, 1 * H:2 * H])
            g = jnp.tanh(gates[:, 2 * H:3 * H])
            o = jax.nn.sigmoid(gates[:, 3 * H:4 * H])
            c[l] = f * c[l] + i * g
            h[l] = o * jnp.tanh(c[l])
            inp = h[l]
        acc = acc + jnp.maximum(inp, 0.0)
    return acc


if __name__ == "__main__":
    B = 2          # batch
    INPUT_DIM = 8  # sequence length after reshape(-1, input_dim, 1)
    HIDDEN_DIM = 32

    key = jax.random.PRNGKey(0)
    kx, kp = jax.random.split(key)
    x = jax.random.normal(kx, (B, INPUT_DIM), jnp.float32)
    params = init_lstm_params(kp, HIDDEN_DIM)

    out = layout_extractor_forward(x, params, HIDDEN_DIM)
    out = jax.block_until_ready(out)

    ref = ref_forward(x, params, HIDDEN_DIM)
    assert out.shape == (B, HIDDEN_DIM)
    np.testing.assert_allclose(np.asarray(out), np.asarray(ref),
                               rtol=1e-4, atol=1e-4)

    # TODO(synk): conv_encoder is defined in the PyTorch module but never used
    # in forward(), so it is intentionally not implemented here.
    print("KERNEL_OK")
</pallas_src>

<mosaic_0001>
module attributes {stable_mosaic.version = 11 : i64} {
  func.func @_lstm_sum_kernel(%arg0: memref<2x8xf32, #tpu.memory_space<vmem>>, %arg1: memref<1x128xf32, #tpu.memory_space<vmem>>, %arg2: memref<2x32x128xf32, #tpu.memory_space<vmem>>, %arg3: memref<3x32x128xf32, #tpu.memory_space<vmem>>, %arg4: memref<3x1x128xf32, #tpu.memory_space<vmem>>, %arg5: memref<2x32xf32, #tpu.memory_space<vmem>>) attributes {dimension_semantics = [], scalar_prefetch = 0 : i64, scratch_operands = 0 : i64, tpu.core_type = #tpu.core_type<tc>} {
    %c0 = arith.constant 0 : index
    %c0_0 = arith.constant 0 : index
    %0 = vector.load %arg0[%c0, %c0_0] : memref<2x8xf32, #tpu.memory_space<vmem>>, vector<2x8xf32>
    %c0_1 = arith.constant 0 : index
    %c0_2 = arith.constant 0 : index
    %1 = vector.load %arg1[%c0_1, %c0_2] : memref<1x128xf32, #tpu.memory_space<vmem>>, vector<1x128xf32>
    %c0_3 = arith.constant 0 : index
    %c0_4 = arith.constant 0 : index
    %c0_5 = arith.constant 0 : index
    %2 = vector.load %arg2[%c0_3, %c0_4, %c0_5] : memref<2x32x128xf32, #tpu.memory_space<vmem>>, vector<1x32x128xf32>
    %3 = vector.shape_cast %2 : vector<1x32x128xf32> to vector<32x128xf32>
    %c1 = arith.constant 1 : index
    %c0_6 = arith.constant 0 : index
    %c0_7 = arith.constant 0 : index
    %4 = vector.load %arg2[%c1, %c0_6, %c0_7] : memref<2x32x128xf32, #tpu.memory_space<vmem>>, vector<1x32x128xf32>
    %5 = vector.shape_cast %4 : vector<1x32x128xf32> to vector<32x128xf32>
    %c0_8 = arith.constant 0 : index
    %c0_9 = arith.constant 0 : index
    %c0_10 = arith.constant 0 : index
    %6 = vector.load %arg3[%c0_8, %c0_9, %c0_10] : memref<3x32x128xf32, #tpu.memory_space<vmem>>, vector<1x32x128xf32>
    %7 = vector.shape_cast %6 : vector<1x32x128xf32> to vector<32x128xf32>
    %c1_11 = arith.constant 1 : index
    %c0_12 = arith.constant 0 : index
    %c0_13 = arith.constant 0 : index
    %8 = vector.load %arg3[%c1_11, %c0_12, %c0_13] : memref<3x32x128xf32, #tpu.memory_space<vmem>>, vector<1x32x128xf32>
    %9 = vector.shape_cast %8 : vector<1x32x128xf32> to vector<32x128xf32>
    %c2 = arith.constant 2 : index
    %c0_14 = arith.constant 0 : index
    %c0_15 = arith.constant 0 : index
    %10 = vector.load %arg3[%c2, %c0_14, %c0_15] : memref<3x32x128xf32, #tpu.memory_space<vmem>>, vector<1x32x128xf32>
    %11 = vector.shape_cast %10 : vector<1x32x128xf32> to vector<32x128xf32>
    %c0_16 = arith.constant 0 : index
    %c0_17 = arith.constant 0 : index
    %c0_18 = arith.constant 0 : index
    %12 = vector.load %arg4[%c0_16, %c0_17, %c0_18] : memref<3x1x128xf32, #tpu.memory_space<vmem>>, vector<1x1x128xf32>
    %13 = vector.shape_cast %12 : vector<1x1x128xf32> to vector<1x128xf32>
    %c1_19 = arith.constant 1 : index
    %c0_20 = arith.constant 0 : index
    %c0_21 = arith.constant 0 : index
    %14 = vector.load %arg4[%c1_19, %c0_20, %c0_21] : memref<3x1x128xf32, #tpu.memory_space<vmem>>, vector<1x1x128xf32>
    %15 = vector.shape_cast %14 : vector<1x1x128xf32> to vector<1x128xf32>
    %c2_22 = arith.constant 2 : index
    %c0_23 = arith.constant 0 : index
    %c0_24 = arith.constant 0 : index
    %16 = vector.load %arg4[%c2_22, %c0_23, %c0_24] : memref<3x1x128xf32, #tpu.memory_space<vmem>>, vector<1x1x128xf32>
    %17 = vector.shape_cast %16 : vector<1x1x128xf32> to vector<1x128xf32>
    %18 = vector.extract_strided_slice %0 {offsets = [0, 0], sizes = [2, 1], strides = [1, 1]} : vector<2x8xf32> to vector<2x1xf32>
    %19 = vector.broadcast %18 : vector<2x1xf32> to vector<2x128xf32>
    %20 = vector.broadcast %1 : vector<1x128xf32> to vector<2x128xf32>
    %21 = arith.mulf %19, %20 : vector<2x128xf32>
    %22 = vector.broadcast %13 : vector<1x128xf32> to vector<2x128xf32>
    %23 = arith.addf %21, %22 : vector<2x128xf32>
    %24 = vector.extract_strided_slice %0 {offsets = [0, 1], sizes = [2, 1], strides = [1, 1]} : vector<2x8xf32> to vector<2x1xf32>
    %25 = vector.broadcast %24 : vector<2x1xf32> to vector<2x128xf32>
    %26 = vector.broadcast %1 : vector<1x128xf32> to vector<2x128xf32>
    %27 = arith.mulf %25, %26 : vector<2x128xf32>
    %28 = vector.broadcast %13 : vector<1x128xf32> to vector<2x128xf32>
    %29 = arith.addf %27, %28 : vector<2x128xf32>
    %30 = vector.extract_strided_slice %0 {offsets = [0, 2], sizes = [2, 1], strides = [1, 1]} : vector<2x8xf32> to vector<2x1xf32>
    %31 = vector.broadcast %30 : vector<2x1xf32> to vector<2x128xf32>
    %32 = vector.broadcast %1 : vector<1x128xf32> to vector<2x128xf32>
    %33 = arith.mulf %31, %32 : vector<2x128xf32>
    %34 = vector.broadcast %13 : vector<1x128xf32> to vector<2x128xf32>
    %35 = arith.addf %33, %34 : vector<2x128xf32>
    %36 = vector.extract_strided_slice %0 {offsets = [0, 3], sizes = [2, 1], strides = [1, 1]} : vector<2x8xf32> to vector<2x1xf32>
    %37 = vector.broadcast %36 : vector<2x1xf32> to vector<2x128xf32>
    %38 = vector.broadcast %1 : vector<1x128xf32> to vector<2x128xf32>
    %39 = arith.mulf %37, %38 : vector<2x128xf32>
    %40 = vector.broadcast %13 : vector<1x128xf32> to vector<2x128xf32>
    %41 = arith.addf %39, %40 : vector<2x128xf32>
    %42 = vector.extract_strided_slice %0 {offsets = [0, 4], sizes = [2, 1], strides = [1, 1]} : vector<2x8xf32> to vector<2x1xf32>
    %43 = vector.broadcast %42 : vector<2x1xf32> to vector<2x128xf32>
    %44 = vector.broadcast %1 : vector<1x128xf32> to vector<2x128xf32>
    %45 = arith.mulf %43, %44 : vector<2x128xf32>
    %46 = vector.broadcast %13 : vector<1x128xf32> to vector<2x128xf32>
    %47 = arith.addf %45, %46 : vector<2x128xf32>
    %48 = vector.extract_strided_slice %0 {offsets = [0, 5], sizes = [2, 1], strides = [1, 1]} : vector<2x8xf32> to vector<2x1xf32>
    %49 = vector.broadcast %48 : vector<2x1xf32> to vector<2x128xf32>
    %50 = vector.broadcast %1 : vector<1x128xf32> to vector<2x128xf32>
    %51 = arith.mulf %49, %50 : vector<2x128xf32>
    %52 = vector.broadcast %13 : vector<1x128xf32> to vector<2x128xf32>
    %53 = arith.addf %51, %52 : vector<2x128xf32>
    %54 = vector.extract_strided_slice %0 {offsets = [0, 6], sizes = [2, 1], strides = [1, 1]} : vector<2x8xf32> to vector<2x1xf32>
    %55 = vector.broadcast %54 : vector<2x1xf32> to vector<2x128xf32>
    %56 = vector.broadcast %1 : vector<1x128xf32> to vector<2x128xf32>
    %57 = arith.mulf %55, %56 : vector<2x128xf32>
    %58 = vector.broadcast %13 : vector<1x128xf32> to vector<2x128xf32>
    %59 = arith.addf %57, %58 : vector<2x128xf32>
    %60 = vector.extract_strided_slice %0 {offsets = [0, 7], sizes = [2, 1], strides = [1, 1]} : vector<2x8xf32> to vector<2x1xf32>
    %61 = vector.broadcast %60 : vector<2x1xf32> to vector<2x128xf32>
    %62 = vector.broadcast %1 : vector<1x128xf32> to vector<2x128xf32>
    %63 = arith.mulf %61, %62 : vector<2x128xf32>
    %64 = vector.broadcast %13 : vector<1x128xf32> to vector<2x128xf32>
    %65 = arith.addf %63, %64 : vector<2x128xf32>
    %cst = arith.constant 0.000000e+00 : f32
    %66 = vector.broadcast %cst : f32 to vector<2x32xf32>
    %cst_25 = arith.constant dense<0.000000e+00> : vector<2x128xf32>
    %67 = tpu.matmul %66, %7, %cst_25 {dimension_numbers = #tpu.dot_dimension_numbers<[1], [0], [0], [1], [0, 0, 1, 1], [], []>} : vector<2x32xf32>, vector<32x128xf32>, vector<2x128xf32> -> vector<2x128xf32>
    %68 = arith.addf %23, %67 : vector<2x128xf32>
    %69 = math.tanh %68 : vector<2x128xf32>
    %70 = vector.extract_strided_slice %69 {offsets = [0, 0], sizes = [2, 32], strides = [1, 1]} : vector<2x128xf32> to vector<2x32xf32>
    %cst_26 = arith.constant 5.000000e-01 : f32
    %71 = vector.broadcast %cst_26 : f32 to vector<2x32xf32>
    %72 = arith.mulf %71, %70 : vector<2x32xf32>
    %cst_27 = arith.constant 5.000000e-01 : f32
    %73 = vector.broadcast %cst_27 : f32 to vector<2x32xf32>
    %74 = arith.addf %72, %73 : vector<2x32xf32>
    %75 = vector.extract_strided_slice %69 {offsets = [0, 32], sizes = [2, 32], strides = [1, 1]} : vector<2x128xf32> to vector<2x32xf32>
    %cst_28 = arith.constant 5.000000e-01 : f32
    %76 = vector.broadcast %cst_28 : f32 to vector<2x32xf32>
    %77 = arith.mulf %76, %75 : vector<2x32xf32>
    %cst_29 = arith.constant 5.000000e-01 : f32
    %78 = vector.broadcast %cst_29 : f32 to vector<2x32xf32>
    %79 = arith.addf %77, %78 : vector<2x32xf32>
    %80 = vector.extract_strided_slice %69 {offsets = [0, 64], sizes = [2, 32], strides = [1, 1]} : vector<2x128xf32> to vector<2x32xf32>
    %81 = vector.extract_strided_slice %69 {offsets = [0, 96], sizes = [2, 32], strides = [1, 1]} : vector<2x128xf32> to vector<2x32xf32>
    %cst_30 = arith.constant 5.000000e-01 : f32
    %82 = vector.broadcast %cst_30 : f32 to vector<2x32xf32>
    %83 = arith.mulf %82, %81 : vector<2x32xf32>
    %cst_31 = arith.constant 5.000000e-01 : f32
    %84 = vector.broadcast %cst_31 : f32 to vector<2x32xf32>
    %85 = arith.addf %83, %84 : vector<2x32xf32>
    %86 = arith.mulf %79, %66 : vector<2x32xf32>
    %87 = arith.mulf %74, %80 : vector<2x32xf32>
    %88 = arith.addf %86, %87 : vector<2x32xf32>
    %89 = math.tanh %88 : vector<2x32xf32>
    %90 = arith.mulf %85, %89 : vector<2x32xf32>
    %cst_32 = arith.constant dense<0.000000e+00> : vector<2x128xf32>
    %91 = tpu.matmul %90, %3, %cst_32 {dimension_numbers = #tpu.dot_dimension_numbers<[1], [0], [0], [1], [0, 0, 1, 1], [], []>} : vector<2x32xf32>, vector<32x128xf32>, vector<2x128xf32> -> vector<2x128xf32>
    %cst_33 = arith.constant dense<0.000000e+00> : vector<2x128xf32>
    %92 = tpu.matmul %66, %9, %cst_33 {dimension_numbers = #tpu.dot_dimension_numbers<[1], [0], [0], [1], [0, 0, 1, 1], [], []>} : vector<2x32xf32>, vector<32x128xf32>, vector<2x128xf32> -> vector<2x128xf32>
    %93 = arith.addf %91, %92 : vector<2x128xf32>
    %94 = vector.broadcast %15 : vector<1x128xf32> to vector<2x128xf32>
    %95 = arith.addf %93, %94 : vector<2x128xf32>
    %96 = math.tanh %95 : vector<2x128xf32>
    %97 = vector.extract_strided_slice %96 {offsets = [0, 0], sizes = [2, 32], strides = [1, 1]} : vector<2x128xf32> to vector<2x32xf32>
    %cst_34 = arith.constant 5.000000e-01 : f32
    %98 = vector.broadcast %cst_34 : f32 to vector<2x32xf32>
    %99 = arith.mulf %98, %97 : vector<2x32xf32>
    %cst_35 = arith.constant 5.000000e-01 : f32
    %100 = vector.broadcast %cst_35 : f32 to vector<2x32xf32>
    %101 = arith.addf %99, %100 : vector<2x32xf32>
    %102 = vector.extract_strided_slice %96 {offsets = [0, 32], sizes = [2, 32], strides = [1, 1]} : vector<2x128xf32> to vector<2x32xf32>
    %cst_36 = arith.constant 5.000000e-01 : f32
    %103 = vector.broadcast %cst_36 : f32 to vector<2x32xf32>
    %104 = arith.mulf %103, %102 : vector<2x32xf32>
    %cst_37 = arith.constant 5.000000e-01 : f32
    %105 = vector.broadcast %cst_37 : f32 to vector<2x32xf32>
    %106 = arith.addf %104, %105 : vector<2x32xf32>
    %107 = vector.extract_strided_slice %96 {offsets = [0, 64], sizes = [2, 32], strides = [1, 1]} : vector<2x128xf32> to vector<2x32xf32>
    %108 = vector.extract_strided_slice %96 {offsets = [0, 96], sizes = [2, 32], strides = [1, 1]} : vector<2x128xf32> to vector<2x32xf32>
    %cst_38 = arith.constant 5.000000e-01 : f32
    %109 = vector.broadcast %cst_38 : f32 to vector<2x32xf32>
    %110 = arith.mulf %109, %108 : vector<2x32xf32>
    %cst_39 = arith.constant 5.000000e-01 : f32
    %111 = vector.broadcast %cst_39 : f32 to vector<2x32xf32>
    %112 = arith.addf %110, %111 : vector<2x32xf32>
    %113 = arith.mulf %106, %66 : vector<2x32xf32>
    %114 = arith.mulf %101, %107 : vector<2x32xf32>
    %115 = arith.addf %113, %114 : vector<2x32xf32>
    %116 = math.tanh %115 : vector<2x32xf32>
    %117 = arith.mulf %112, %116 : vector<2x32xf32>
    %cst_40 = arith.constant dense<0.000000e+00> : vector<2x128xf32>
    %118 = tpu.matmul %117, %5, %cst_40 {dimension_numbers = #tpu.dot_dimension_numbers<[1], [0], [0], [1], [0, 0, 1, 1], [], []>} : vector<2x32xf32>, vector<32x128xf32>, vector<2x128xf32> -> vector<2x128xf32>
    %cst_41 = arith.constant dense<0.000000e+00> : vector<2x128xf32>
    %119 = tpu.matmul %66, %11, %cst_41 {dimension_numbers = #tpu.dot_dimension_numbers<[1], [0], [0], [1], [0, 0, 1, 1], [], []>} : vector<2x32xf32>, vector<32x128xf32>, vector<2x128xf32> -> vector<2x128xf32>
    %120 = arith.addf %118, %119 : vector<2x128xf32>
    %121 = vector.broadcast %17 : vector<1x128xf32> to vector<2x128xf32>
    %122 = arith.addf %120, %121 : vector<2x128xf32>
    %123 = math.tanh %122 : vector<2x128xf32>
    %124 = vector.extract_strided_slice %123 {offsets = [0, 0], sizes = [2, 32], strides = [1, 1]} : vector<2x128xf32> to vector<2x32xf32>
    %cst_42 = arith.constant 5.000000e-01 : f32
    %125 = vector.broadcast %cst_42 : f32 to vector<2x32xf32>
    %126 = arith.mulf %125, %124 : vector<2x32xf32>
    %cst_43 = arith.constant 5.000000e-01 : f32
    %127 = vector.broadcast %cst_43 : f32 to vector<2x32xf32>
    %128 = arith.addf %126, %127 : vector<2x32xf32>
    %129 = vector.extract_strided_slice %123 {offsets = [0, 32], sizes = [2, 32], strides = [1, 1]} : vector<2x128xf32> to vector<2x32xf32>
    %cst_44 = arith.constant 5.000000e-01 : f32
    %130 = vector.broadcast %cst_44 : f32 to vector<2x32xf32>
    %131 = arith.mulf %130, %129 : vector<2x32xf32>
    %cst_45 = arith.constant 5.000000e-01 : f32
    %132 = vector.broadcast %cst_45 : f32 to vector<2x32xf32>
    %133 = arith.addf %131, %132 : vector<2x32xf32>
    %134 = vector.extract_strided_slice %123 {offsets = [0, 64], sizes = [2, 32], strides = [1, 1]} : vector<2x128xf32> to vector<2x32xf32>
    %135 = vector.extract_strided_slice %123 {offsets = [0, 96], sizes = [2, 32], strides = [1, 1]} : vector<2x128xf32> to vector<2x32xf32>
    %cst_46 = arith.constant 5.000000e-01 : f32
    %136 = vector.broadcast %cst_46 : f32 to vector<2x32xf32>
    %137 = arith.mulf %136, %135 : vector<2x32xf32>
    %cst_47 = arith.constant 5.000000e-01 : f32
    %138 = vector.broadcast %cst_47 : f32 to vector<2x32xf32>
    %139 = arith.addf %137, %138 : vector<2x32xf32>
    %140 = arith.mulf %133, %66 : vector<2x32xf32>
    %141 = arith.mulf %128, %134 : vector<2x32xf32>
    %142 = arith.addf %140, %141 : vector<2x32xf32>
    %143 = math.tanh %142 : vector<2x32xf32>
    %144 = arith.mulf %139, %143 : vector<2x32xf32>
    %cst_48 = arith.constant 0.000000e+00 : f32
    %145 = vector.broadcast %cst_48 : f32 to vector<2x32xf32>
    %146 = arith.maximumf %144, %145 : vector<2x32xf32>
    %147 = arith.addf %66, %146 : vector<2x32xf32>
    %cst_49 = arith.constant dense<0.000000e+00> : vector<2x128xf32>
    %148 = tpu.matmul %90, %7, %cst_49 {dimension_numbers = #tpu.dot_dimension_numbers<[1], [0], [0], [1], [0, 0, 1, 1], [], []>} : vector<2x32xf32>, vector<32x128xf32>, vector<2x128xf32> -> vector<2x128xf32>
    %149 = arith.addf %29, %148 : vector<2x128xf32>
    %150 = math.tanh %149 : vector<2x128xf32>
    %151 = vector.extract_strided_slice %150 {offsets = [0, 0], sizes = [2, 32], strides = [1, 1]} : vector<2x128xf32> to vector<2x32xf32>
    %cst_50 = arith.constant 5.000000e-01 : f32
    %152 = vector.broadcast %cst_50 : f32 to vector<2x32xf32>
    %153 = arith.mulf %152, %151 : vector<2x32xf32>
    %cst_51 = arith.constant 5.000000e-01 : f32
    %154 = vector.broadcast %cst_51 : f32 to vector<2x32xf32>
    %155 = arith.addf %153, %154 : vector<2x32xf32>
    %156 = vector.extract_strided_slice %150 {offsets = [0, 32], sizes = [2, 32], strides = [1, 1]} : vector<2x128xf32> to vector<2x32xf32>
    %cst_52 = arith.constant 5.000000e-01 : f32
    %157 = vector.broadcast %cst_52 : f32 to vector<2x32xf32>
    %158 = arith.mulf %157, %156 : vector<2x32xf32>
    %cst_53 = arith.constant 5.000000e-01 : f32
    %159 = vector.broadcast %cst_53 : f32 to vector<2x32xf32>
    %160 = arith.addf %158, %159 : vector<2x32xf32>
    %161 = vector.extract_strided_slice %150 {offsets = [0, 64], sizes = [2, 32], strides = [1, 1]} : vector<2x128xf32> to vector<2x32xf32>
    %162 = vector.extract_strided_slice %150 {offsets = [0, 96], sizes = [2, 32], strides = [1, 1]} : vector<2x128xf32> to vector<2x32xf32>
    %cst_54 = arith.constant 5.000000e-01 : f32
    %163 = vector.broadcast %cst_54 : f32 to vector<2x32xf32>
    %164 = arith.mulf %163, %162 : vector<2x32xf32>
    %cst_55 = arith.constant 5.000000e-01 : f32
    %165 = vector.broadcast %cst_55 : f32 to vector<2x32xf32>
    %166 = arith.addf %164, %165 : vector<2x32xf32>
    %167 = arith.mulf %160, %88 : vector<2x32xf32>
    %168 = arith.mulf %155, %161 : vector<2x32xf32>
    %169 = arith.addf %167, %168 : vector<2x32xf32>
    %170 = math.tanh %169 : vector<2x32xf32>
    %171 = arith.mulf %166, %170 : vector<2x32xf32>
    %cst_56 = arith.constant dense<0.000000e+00> : vector<2x128xf32>
    %172 = tpu.matmul %171, %3, %cst_56 {dimension_numbers = #tpu.dot_dimension_numbers<[1], [0], [0], [1], [0, 0, 1, 1], [], []>} : vector<2x32xf32>, vector<32x128xf32>, vector<2x128xf32> -> vector<2x128xf32>
    %cst_57 = arith.constant dense<0.000000e+00> : vector<2x128xf32>
    %173 = tpu.matmul %117, %9, %cst_57 {dimension_numbers = #tpu.dot_dimension_numbers<[1], [0], [0], [1], [0, 0, 1, 1], [], []>} : vector<2x32xf32>, vector<32x128xf32>, vector<2x128xf32> -> vector<2x128xf32>
    %174 = arith.addf %172, %173 : vector<2x128xf32>
    %175 = vector.broadcast %15 : vector<1x128xf32> to vector<2x128xf32>
    %176 = arith.addf %174, %175 : vector<2x128xf32>
    %177 = math.tanh %176 : vector<2x128xf32>
    %178 = vector.extract_strided_slice %177 {offsets = [0, 0], sizes = [2, 32], strides = [1, 1]} : vector<2x128xf32> to vector<2x32xf32>
    %cst_58 = arith.constant 5.000000e-01 : f32
    %179 = vector.broadcast %cst_58 : f32 to vector<2x32xf32>
    %180 = arith.mulf %179, %178 : vector<2x32xf32>
    %cst_59 = arith.constant 5.000000e-01 : f32
    %181 = vector.broadcast %cst_59 : f32 to vector<2x32xf32>
    %182 = arith.addf %180, %181 : vector<2x32xf32>
    %183 = vector.extract_strided_slice %177 {offsets = [0, 32], sizes = [2, 32], strides = [1, 1]} : vector<2x128xf32> to vector<2x32xf32>
    %cst_60 = arith.constant 5.000000e-01 : f32
    %184 = vector.broadcast %cst_60 : f32 to vector<2x32xf32>
    %185 = arith.mulf %184, %183 : vector<2x32xf32>
    %cst_61 = arith.constant 5.000000e-01 : f32
    %186 = vector.broadcast %cst_61 : f32 to vector<2x32xf32>
    %187 = arith.addf %185, %186 : vector<2x32xf32>
    %188 = vector.extract_strided_slice %177 {offsets = [0, 64], sizes = [2, 32], strides = [1, 1]} : vector<2x128xf32> to vector<2x32xf32>
    %189 = vector.extract_strided_slice %177 {offsets = [0, 96], sizes = [2, 32], strides = [1, 1]} : vector<2x128xf32> to vector<2x32xf32>
    %cst_62 = arith.constant 5.000000e-01 : f32
    %190 = vector.broadcast %cst_62 : f32 to vector<2x32xf32>
    %191 = arith.mulf %190, %189 : vector<2x32xf32>
    %cst_63 = arith.constant 5.000000e-01 : f32
    %192 = vector.broadcast %cst_63 : f32 to vector<2x32xf32>
    %193 = arith.addf %191, %192 : vector<2x32xf32>
    %194 = arith.mulf %187, %115 : vector<2x32xf32>
    %195 = arith.mulf %182, %188 : vector<2x32xf32>
    %196 = arith.addf %194, %195 : vector<2x32xf32>
    %197 = math.tanh %196 : vector<2x32xf32>
    %198 = arith.mulf %193, %197 : vector<2x32xf32>
    %cst_64 = arith.constant dense<0.000000e+00> : vector<2x128xf32>
    %199 = tpu.matmul %198, %5, %cst_64 {dimension_numbers = #tpu.dot_dimension_numbers<[1], [0], [0], [1], [0, 0, 1, 1], [], []>} : vector<2x32xf32>, vector<32x128xf32>, vector<2x128xf32> -> vector<2x128xf32>
    %cst_65 = arith.constant dense<0.000000e+00> : vector<2x128xf32>
    %200 = tpu.matmul %144, %11, %cst_65 {dimension_numbers = #tpu.dot_dimension_numbers<[1], [0], [0], [1], [0, 0, 1, 1], [], []>} : vector<2x32xf32>, vector<32x128xf32>, vector<2x128xf32> -> vector<2x128xf32>
    %201 = arith.addf %199, %200 : vector<2x128xf32>
    %202 = vector.broadcast %17 : vector<1x128xf32> to vector<2x128xf32>
    %203 = arith.addf %201, %202 : vector<2x128xf32>
    %204 = math.tanh %203 : vector<2x128xf32>
    %205 = vector.extract_strided_slice %204 {offsets = [0, 0], sizes = [2, 32], strides = [1, 1]} : vector<2x128xf32> to vector<2x32xf32>
    %cst_66 = arith.constant 5.000000e-01 : f32
    %206 = vector.broadcast %cst_66 : f32 to vector<2x32xf32>
    %207 = arith.mulf %206, %205 : vector<2x32xf32>
    %cst_67 = arith.constant 5.000000e-01 : f32
    %208 = vector.broadcast %cst_67 : f32 to vector<2x32xf32>
    %209 = arith.addf %207, %208 : vector<2x32xf32>
    %210 = vector.extract_strided_slice %204 {offsets = [0, 32], sizes = [2, 32], strides = [1, 1]} : vector<2x128xf32> to vector<2x32xf32>
    %cst_68 = arith.constant 5.000000e-01 : f32
    %211 = vector.broadcast %cst_68 : f32 to vector<2x32xf32>
    %212 = arith.mulf %211, %210 : vector<2x32xf32>
    %cst_69 = arith.constant 5.000000e-01 : f32
    %213 = vector.broadcast %cst_69 : f32 to vector<2x32xf32>
    %214 = arith.addf %212, %213 : vector<2x32xf32>
    %215 = vector.extract_strided_slice %204 {offsets = [0, 64], sizes = [2, 32], strides = [1, 1]} : vector<2x128xf32> to vector<2x32xf32>
    %216 = vector.extract_strided_slice %204 {offsets = [0, 96], sizes = [2, 32], strides = [1, 1]} : vector<2x128xf32> to vector<2x32xf32>
    %cst_70 = arith.constant 5.000000e-01 : f32
    %217 = vector.broadcast %cst_70 : f32 to vector<2x32xf32>
    %218 = arith.mulf %217, %216 : vector<2x32xf32>
    %cst_71 = arith.constant 5.000000e-01 : f32
    %219 = vector.broadcast %cst_71 : f32 to vector<2x32xf32>
    %220 = arith.addf %218, %219 : vector<2x32xf32>
    %221 = arith.mulf %214, %142 : vector<2x32xf32>
    %222 = arith.mulf %209, %215 : vector<2x32xf32>
    %223 = arith.addf %221, %222 : vector<2x32xf32>
    %224 = math.tanh %223 : vector<2x32xf32>
    %225 = arith.mulf %220, %224 : vector<2x32xf32>
    %cst_72 = arith.constant 0.000000e+00 : f32
    %226 = vector.broadcast %cst_72 : f32 to vector<2x32xf32>
    %227 = arith.maximumf %225, %226 : vector<2x32xf32>
    %228 = arith.addf %147, %227 : vector<2x32xf32>
    %cst_73 = arith.constant dense<0.000000e+00> : vector<2x128xf32>
    %229 = tpu.matmul %171, %7, %cst_73 {dimension_numbers = #tpu.dot_dimension_numbers<[1], [0], [0], [1], [0, 0, 1, 1], [], []>} : vector<2x32xf32>, vector<32x128xf32>, vector<2x128xf32> -> vector<2x128xf32>
    %230 = arith.addf %35, %229 : vector<2x128xf32>
    %231 = math.tanh %230 : vector<2x128xf32>
    %232 = vector.extract_strided_slice %231 {offsets = [0, 0], sizes = [2, 32], strides = [1, 1]} : vector<2x128xf32> to vector<2x32xf32>
    %cst_74 = arith.constant 5.000000e-01 : f32
    %233 = vector.broadcast %cst_74 : f32 to vector<2x32xf32>
    %234 = arith.mulf %233, %232 : vector<2x32xf32>
    %cst_75 = arith.constant 5.000000e-01 : f32
    %235 = vector.broadcast %cst_75 : f32 to vector<2x32xf32>
    %236 = arith.addf %234, %235 : vector<2x32xf32>
    %237 = vector.extract_strided_slice %231 {offsets = [0, 32], sizes = [2, 32], strides = [1, 1]} : vector<2x128xf32> to vector<2x32xf32>
    %cst_76 = arith.constant 5.000000e-01 : f32
    %238 = vector.broadcast %cst_76 : f32 to vector<2x32xf32>
    %239 = arith.mulf %238, %237 : vector<2x32xf32>
    %cst_77 = arith.constant 5.000000e-01 : f32
    %240 = vector.broadcast %cst_77 : f32 to vector<2x32xf32>
    %241 = arith.addf %239, %240 : vector<2x32xf32>
    %242 = vector.extract_strided_slice %231 {offsets = [0, 64], sizes = [2, 32], strides = [1, 1]} : vector<2x128xf32> to vector<2x32xf32>
    %243 = vector.extract_strided_slice %231 {offsets = [0, 96], sizes = [2, 32], strides = [1, 1]} : vector<2x128xf32> to vector<2x32xf32>
    %cst_78 = arith.constant 5.000000e-01 : f32
    %244 = vector.broadcast %cst_78 : f32 to vector<2x32xf32>
    %245 = arith.mulf %244, %243 : vector<2x32xf32>
    %cst_79 = arith.constant 5.000000e-01 : f32
    %246 = vector.broadcast %cst_79 : f32 to vector<2x32xf32>
    %247 = arith.addf %245, %246 : vector<2x32xf32>
    %248 = arith.mulf %241, %169 : vector<2x32xf32>
    %249 = arith.mulf %236, %242 : vector<2x32xf32>
    %250 = arith.addf %248, %249 : vector<2x32xf32>
    %251 = math.tanh %250 : vector<2x32xf32>
    %252 = arith.mulf %247, %251 : vector<2x32xf32>
    %cst_80 = arith.constant dense<0.000000e+00> : vector<2x128xf32>
    %253 = tpu.matmul %252, %3, %cst_80 {dimension_numbers = #tpu.dot_dimension_numbers<[1], [0], [0], [1], [0, 0, 1, 1], [], []>} : vector<2x32xf32>, vector<32x128xf32>, vector<2x128xf32> -> vector<2x128xf32>
    %cst_81 = arith.constant dense<0.000000e+00> : vector<2x128xf32>
    %254 = tpu.matmul %198, %9, %cst_81 {dimension_numbers = #tpu.dot_dimension_numbers<[1], [0], [0], [1], [0, 0, 1, 1], [], []>} : vector<2x32xf32>, vector<32x128xf32>, vector<2x128xf32> -> vector<2x128xf32>
    %255 = arith.addf %253, %254 : vector<2x128xf32>
    %256 = vector.broadcast %15 : vector<1x128xf32> to vector<2x128xf32>
    %257 = arith.addf %255, %256 : vector<2x128xf32>
    %258 = math.tanh %257 : vector<2x128xf32>
    %259 = vector.extract_strided_slice %258 {offsets = [0, 0], sizes = [2, 32], strides = [1, 1]} : vector<2x128xf32> to vector<2x32xf32>
    %cst_82 = arith.constant 5.000000e-01 : f32
    %260 = vector.broadcast %cst_82 : f32 to vector<2x32xf32>
    %261 = arith.mulf %260, %259 : vector<2x32xf32>
    %cst_83 = arith.constant 5.000000e-01 : f32
    %262 = vector.broadcast %cst_83 : f32 to vector<2x32xf32>
    %263 = arith.addf %261, %262 : vector<2x32xf32>
    %264 = vector.extract_strided_slice %258 {offsets = [0, 32], sizes = [2, 32], strides = [1, 1]} : vector<2x128xf32> to vector<2x32xf32>
    %cst_84 = arith.constant 5.000000e-01 : f32
    %265 = vector.broadcast %cst_84 : f32 to vector<2x32xf32>
    %266 = arith.mulf %265, %264 : vector<2x32xf32>
    %cst_85 = arith.constant 5.000000e-01 : f32
    %267 = vector.broadcast %cst_85 : f32 to vector<2x32xf32>
    %268 = arith.addf %266, %267 : vector<2x32xf32>
    %269 = vector.extract_strided_slice %258 {offsets = [0, 64], sizes = [2, 32], strides = [1, 1]} : vector<2x128xf32> to vector<2x32xf32>
    %270 = vector.extract_strided_slice %258 {offsets = [0, 96], sizes = [2, 32], strides = [1, 1]} : vector<2x128xf32> to vector<2x32xf32>
    %cst_86 = arith.constant 5.000000e-01 : f32
    %271 = vector.broadcast %cst_86 : f32 to vector<2x32xf32>
    %272 = arith.mulf %271, %270 : vector<2x32xf32>
    %cst_87 = arith.constant 5.000000e-01 : f32
    %273 = vector.broadcast %cst_87 : f32 to vector<2x32xf32>
    %274 = arith.addf %272, %273 : vector<2x32xf32>
    %275 = arith.mulf %268, %196 : vector<2x32xf32>
    %276 = arith.mulf %263, %269 : vector<2x32xf32>
    %277 = arith.addf %275, %276 : vector<2x32xf32>
    %278 = math.tanh %277 : vector<2x32xf32>
    %279 = arith.mulf %274, %278 : vector<2x32xf32>
    %cst_88 = arith.constant dense<0.000000e+00> : vector<2x128xf32>
    %280 = tpu.matmul %279, %5, %cst_88 {dimension_numbers = #tpu.dot_dimension_numbers<[1], [0], [0], [1], [0, 0, 1, 1], [], []>} : vector<2x32xf32>, vector<32x128xf32>, vector<2x128xf32> -> vector<2x128xf32>
    %cst_89 = arith.constant dense<0.000000e+00> : vector<2x128xf32>
    %281 = tpu.matmul %225, %11, %cst_89 {dimension_numbers = #tpu.dot_dimension_numbers<[1], [0], [0], [1], [0, 0, 1, 1], [], []>} : vector<2x32xf32>, vector<32x128xf32>, vector<2x128xf32> -> vector<2x128xf32>
    %282 = arith.addf %280, %281 : vector<2x128xf32>
    %283 = vector.broadcast %17 : vector<1x128xf32> to vector<2x128xf32>
    %284 = arith.addf %282, %283 : vector<2x128xf32>
    %285 = math.tanh %284 : vector<2x128xf32>
    %286 = vector.extract_strided_slice %285 {offsets = [0, 0], sizes = [2, 32], strides = [1, 1]} : vector<2x128xf32> to vector<2x32xf32>
    %cst_90 = arith.constant 5.000000e-01 : f32
    %287 = vector.broadcast %cst_90 : f32 to vector<2x32xf32>
    %288 = arith.mulf %287, %286 : vector<2x32xf32>
    %cst_91 = arith.constant 5.000000e-01 : f32
    %289 = vector.broadcast %cst_91 : f32 to vector<2x32xf32>
    %290 = arith.addf %288, %289 : vector<2x32xf32>
    %291 = vector.extract_strided_slice %285 {offsets = [0, 32], sizes = [2, 32], strides = [1, 1]} : vector<2x128xf32> to vector<2x32xf32>
    %cst_92 = arith.constant 5.000000e-01 : f32
    %292 = vector.broadcast %cst_92 : f32 to vector<2x32xf32>
    %293 = arith.mulf %292, %291 : vector<2x32xf32>
    %cst_93 = arith.constant 5.000000e-01 : f32
    %294 = vector.broadcast %cst_93 : f32 to vector<2x32xf32>
    %295 = arith.addf %293, %294 : vector<2x32xf32>
    %296 = vector.extract_strided_slice %285 {offsets = [0, 64], sizes = [2, 32], strides = [1, 1]} : vector<2x128xf32> to vector<2x32xf32>
    %297 = vector.extract_strided_slice %285 {offsets = [0, 96], sizes = [2, 32], strides = [1, 1]} : vector<2x128xf32> to vector<2x32xf32>
    %cst_94 = arith.constant 5.000000e-01 : f32
    %298 = vector.broadcast %cst_94 : f32 to vector<2x32xf32>
    %299 = arith.mulf %298, %297 : vector<2x32xf32>
    %cst_95 = arith.constant 5.000000e-01 : f32
    %300 = vector.broadcast %cst_95 : f32 to vector<2x32xf32>
    %301 = arith.addf %299, %300 : vector<2x32xf32>
    %302 = arith.mulf %295, %223 : vector<2x32xf32>
    %303 = arith.mulf %290, %296 : vector<2x32xf32>
    %304 = arith.addf %302, %303 : vector<2x32xf32>
    %305 = math.tanh %304 : vector<2x32xf32>
    %306 = arith.mulf %301, %305 : vector<2x32xf32>
    %cst_96 = arith.constant 0.000000e+00 : f32
    %307 = vector.broadcast %cst_96 : f32 to vector<2x32xf32>
    %308 = arith.maximumf %306, %307 : vector<2x32xf32>
    %309 = arith.addf %228, %308 : vector<2x32xf32>
    %cst_97 = arith.constant dense<0.000000e+00> : vector<2x128xf32>
    %310 = tpu.matmul %252, %7, %cst_97 {dimension_numbers = #tpu.dot_dimension_numbers<[1], [0], [0], [1], [0, 0, 1, 1], [], []>} : vector<2x32xf32>, vector<32x128xf32>, vector<2x128xf32> -> vector<2x128xf32>
    %311 = arith.addf %41, %310 : vector<2x128xf32>
    %312 = math.tanh %311 : vector<2x128xf32>
    %313 = vector.extract_strided_slice %312 {offsets = [0, 0], sizes = [2, 32], strides = [1, 1]} : vector<2x128xf32> to vector<2x32xf32>
    %cst_98 = arith.constant 5.000000e-01 : f32
    %314 = vector.broadcast %cst_98 : f32 to vector<2x32xf32>
    %315 = arith.mulf %314, %313 : vector<2x32xf32>
    %cst_99 = arith.constant 5.000000e-01 : f32
    %316 = vector.broadcast %cst_99 : f32 to vector<2x32xf32>
    %317 = arith.addf %315, %316 : vector<2x32xf32>
    %318 = vector.extract_strided_slice %312 {offsets = [0, 32], sizes = [2, 32], strides = [1, 1]} : vector<2x128xf32> to vector<2x32xf32>
    %cst_100 = arith.constant 5.000000e-01 : f32
    %319 = vector.broadcast %cst_100 : f32 to vector<2x32xf32>
    %320 = arith.mulf %319, %318 : vector<2x32xf32>
    %cst_101 = arith.constant 5.000000e-01 : f32
    %321 = vector.broadcast %cst_101 : f32 to vector<2x32xf32>
    %322 = arith.addf %320, %321 : vector<2x32xf32>
    %323 = vector.extract_strided_slice %312 {offsets = [0, 64], sizes = [2, 32], strides = [1, 1]} : vector<2x128xf32> to vector<2x32xf32>
    %324 = vector.extract_strided_slice %312 {offsets = [0, 96], sizes = [2, 32], strides = [1, 1]} : vector<2x128xf32> to vector<2x32xf32>
    %cst_102 = arith.constant 5.000000e-01 : f32
    %325 = vector.broadcast %cst_102 : f32 to vector<2x32xf32>
    %326 = arith.mulf %325, %324 : vector<2x32xf32>
    %cst_103 = arith.constant 5.000000e-01 : f32
    %327 = vector.broadcast %cst_103 : f32 to vector<2x32xf32>
    %328 = arith.addf %326, %327 : vector<2x32xf32>
    %329 = arith.mulf %322, %250 : vector<2x32xf32>
    %330 = arith.mulf %317, %323 : vector<2x32xf32>
    %331 = arith.addf %329, %330 : vector<2x32xf32>
    %332 = math.tanh %331 : vector<2x32xf32>
    %333 = arith.mulf %328, %332 : vector<2x32xf32>
    %cst_104 = arith.constant dense<0.000000e+00> : vector<2x128xf32>
    %334 = tpu.matmul %333, %3, %cst_104 {dimension_numbers = #tpu.dot_dimension_numbers<[1], [0], [0], [1], [0, 0, 1, 1], [], []>} : vector<2x32xf32>, vector<32x128xf32>, vector<2x128xf32> -> vector<2x128xf32>
    %cst_105 = arith.constant dense<0.000000e+00> : vector<2x128xf32>
    %335 = tpu.matmul %279, %9, %cst_105 {dimension_numbers = #tpu.dot_dimension_numbers<[1], [0], [0], [1], [0, 0, 1, 1], [], []>} : vector<2x32xf32>, vector<32x128xf32>, vector<2x128xf32> -> vector<2x128xf32>
    %336 = arith.addf %334, %335 : vector<2x128xf32>
    %337 = vector.broadcast %15 : vector<1x128xf32> to vector<2x128xf32>
    %338 = arith.addf %336, %337 : vector<2x128xf32>
    %339 = math.tanh %338 : vector<2x128xf32>
    %340 = vector.extract_strided_slice %339 {offsets = [0, 0], sizes = [2, 32], strides = [1, 1]} : vector<2x128xf32> to vector<2x32xf32>
    %cst_106 = arith.constant 5.000000e-01 : f32
    %341 = vector.broadcast %cst_106 : f32 to vector<2x32xf32>
    %342 = arith.mulf %341, %340 : vector<2x32xf32>
    %cst_107 = arith.constant 5.000000e-01 : f32
    %343 = vector.broadcast %cst_107 : f32 to vector<2x32xf32>
    %344 = arith.addf %342, %343 : vector<2x32xf32>
    %345 = vector.extract_strided_slice %339 {offsets = [0, 32], sizes = [2, 32], strides = [1, 1]} : vector<2x128xf32> to vector<2x32xf32>
    %cst_108 = arith.constant 5.000000e-01 : f32
    %346 = vector.broadcast %cst_108 : f32 to vector<2x32xf32>
    %347 = arith.mulf %346, %345 : vector<2x32xf32>
    %cst_109 = arith.constant 5.000000e-01 : f32
    %348 = vector.broadcast %cst_109 : f32 to vector<2x32xf32>
    %349 = arith.addf %347, %348 : vector<2x32xf32>
    %350 = vector.extract_strided_slice %339 {offsets = [0, 64], sizes = [2, 32], strides = [1, 1]} : vector<2x128xf32> to vector<2x32xf32>
    %351 = vector.extract_strided_slice %339 {offsets = [0, 96], sizes = [2, 32], strides = [1, 1]} : vector<2x128xf32> to vector<2x32xf32>
    %cst_110 = arith.constant 5.000000e-01 : f32
    %352 = vector.broadcast %cst_110 : f32 to vector<2x32xf32>
    %353 = arith.mulf %352, %351 : vector<2x32xf32>
    %cst_111 = arith.constant 5.000000e-01 : f32
    %354 = vector.broadcast %cst_111 : f32 to vector<2x32xf32>
    %355 = arith.addf %353, %354 : vector<2x32xf32>
    %356 = arith.mulf %349, %277 : vector<2x32xf32>
    %357 = arith.mulf %344, %350 : vector<2x32xf32>
    %358 = arith.addf %356, %357 : vector<2x32xf32>
    %359 = math.tanh %358 : vector<2x32xf32>
    %360 = arith.mulf %355, %359 : vector<2x32xf32>
    %cst_112 = arith.constant dense<0.000000e+00> : vector<2x128xf32>
    %361 = tpu.matmul %360, %5, %cst_112 {dimension_numbers = #tpu.dot_dimension_numbers<[1], [0], [0], [1], [0, 0, 1, 1], [], []>} : vector<2x32xf32>, vector<32x128xf32>, vector<2x128xf32> -> vector<2x128xf32>
    %cst_113 = arith.constant dense<0.000000e+00> : vector<2x128xf32>
    %362 = tpu.matmul %306, %11, %cst_113 {dimension_numbers = #tpu.dot_dimension_numbers<[1], [0], [0], [1], [0, 0, 1, 1], [], []>} : vector<2x32xf32>, vector<32x128xf32>, vector<2x128xf32> -> vector<2x128xf32>
    %363 = arith.addf %361, %362 : vector<2x128xf32>
    %364 = vector.broadcast %17 : vector<1x128xf32> to vector<2x128xf32>
    %365 = arith.addf %363, %364 : vector<2x128xf32>
    %366 = math.tanh %365 : vector<2x128xf32>
    %367 = vector.extract_strided_slice %366 {offsets = [0, 0], sizes = [2, 32], strides = [1, 1]} : vector<2x128xf32> to vector<2x32xf32>
    %cst_114 = arith.constant 5.000000e-01 : f32
    %368 = vector.broadcast %cst_114 : f32 to vector<2x32xf32>
    %369 = arith.mulf %368, %367 : vector<2x32xf32>
    %cst_115 = arith.constant 5.000000e-01 : f32
    %370 = vector.broadcast %cst_115 : f32 to vector<2x32xf32>
    %371 = arith.addf %369, %370 : vector<2x32xf32>
    %372 = vector.extract_strided_slice %366 {offsets = [0, 32], sizes = [2, 32], strides = [1, 1]} : vector<2x128xf32> to vector<2x32xf32>
    %cst_116 = arith.constant 5.000000e-01 : f32
    %373 = vector.broadcast %cst_116 : f32 to vector<2x32xf32>
    %374 = arith.mulf %373, %372 : vector<2x32xf32>
    %cst_117 = arith.constant 5.000000e-01 : f32
    %375 = vector.broadcast %cst_117 : f32 to vector<2x32xf32>
    %376 = arith.addf %374, %375 : vector<2x32xf32>
    %377 = vector.extract_strided_slice %366 {offsets = [0, 64], sizes = [2, 32], strides = [1, 1]} : vector<2x128xf32> to vector<2x32xf32>
    %378 = vector.extract_strided_slice %366 {offsets = [0, 96], sizes = [2, 32], strides = [1, 1]} : vector<2x128xf32> to vector<2x32xf32>
    %cst_118 = arith.constant 5.000000e-01 : f32
    %379 = vector.broadcast %cst_118 : f32 to vector<2x32xf32>
    %380 = arith.mulf %379, %378 : vector<2x32xf32>
    %cst_119 = arith.constant 5.000000e-01 : f32
    %381 = vector.broadcast %cst_119 : f32 to vector<2x32xf32>
    %382 = arith.addf %380, %381 : vector<2x32xf32>
    %383 = arith.mulf %376, %304 : vector<2x32xf32>
    %384 = arith.mulf %371, %377 : vector<2x32xf32>
    %385 = arith.addf %383, %384 : vector<2x32xf32>
    %386 = math.tanh %385 : vector<2x32xf32>
    %387 = arith.mulf %382, %386 : vector<2x32xf32>
    %cst_120 = arith.constant 0.000000e+00 : f32
    %388 = vector.broadcast %cst_120 : f32 to vector<2x32xf32>
    %389 = arith.maximumf %387, %388 : vector<2x32xf32>
    %390 = arith.addf %309, %389 : vector<2x32xf32>
    %cst_121 = arith.constant dense<0.000000e+00> : vector<2x128xf32>
    %391 = tpu.matmul %333, %7, %cst_121 {dimension_numbers = #tpu.dot_dimension_numbers<[1], [0], [0], [1], [0, 0, 1, 1], [], []>} : vector<2x32xf32>, vector<32x128xf32>, vector<2x128xf32> -> vector<2x128xf32>
    %392 = arith.addf %47, %391 : vector<2x128xf32>
    %393 = math.tanh %392 : vector<2x128xf32>
    %394 = vector.extract_strided_slice %393 {offsets = [0, 0], sizes = [2, 32], strides = [1, 1]} : vector<2x128xf32> to vector<2x32xf32>
    %cst_122 = arith.constant 5.000000e-01 : f32
    %395 = vector.broadcast %cst_122 : f32 to vector<2x32xf32>
    %396 = arith.mulf %395, %394 : vector<2x32xf32>
    %cst_123 = arith.constant 5.000000e-01 : f32
    %397 = vector.broadcast %cst_123 : f32 to vector<2x32xf32>
    %398 = arith.addf %396, %397 : vector<2x32xf32>
    %399 = vector.extract_strided_slice %393 {offsets = [0, 32], sizes = [2, 32], strides = [1, 1]} : vector<2x128xf32> to vector<2x32xf32>
    %cst_124 = arith.constant 5.000000e-01 : f32
    %400 = vector.broadcast %cst_124 : f32 to vector<2x32xf32>
    %401 = arith.mulf %400, %399 : vector<2x32xf32>
    %cst_125 = arith.constant 5.000000e-01 : f32
    %402 = vector.broadcast %cst_125 : f32 to vector<2x32xf32>
    %403 = arith.addf %401, %402 : vector<2x32xf32>
    %404 = vector.extract_strided_slice %393 {offsets = [0, 64], sizes = [2, 32], strides = [1, 1]} : vector<2x128xf32> to vector<2x32xf32>
    %405 = vector.extract_strided_slice %393 {offsets = [0, 96], sizes = [2, 32], strides = [1, 1]} : vector<2x128xf32> to vector<2x32xf32>
    %cst_126 = arith.constant 5.000000e-01 : f32
    %406 = vector.broadcast %cst_126 : f32 to vector<2x32xf32>
    %407 = arith.mulf %406, %405 : vector<2x32xf32>
    %cst_127 = arith.constant 5.000000e-01 : f32
    %408 = vector.broadcast %cst_127 : f32 to vector<2x32xf32>
    %409 = arith.addf %407, %408 : vector<2x32xf32>
    %410 = arith.mulf %403, %331 : vector<2x32xf32>
    %411 = arith.mulf %398, %404 : vector<2x32xf32>
    %412 = arith.addf %410, %411 : vector<2x32xf32>
    %413 = math.tanh %412 : vector<2x32xf32>
    %414 = arith.mulf %409, %413 : vector<2x32xf32>
    %cst_128 = arith.constant dense<0.000000e+00> : vector<2x128xf32>
    %415 = tpu.matmul %414, %3, %cst_128 {dimension_numbers = #tpu.dot_dimension_numbers<[1], [0], [0], [1], [0, 0, 1, 1], [], []>} : vector<2x32xf32>, vector<32x128xf32>, vector<2x128xf32> -> vector<2x128xf32>
    %cst_129 = arith.constant dense<0.000000e+00> : vector<2x128xf32>
    %416 = tpu.matmul %360, %9, %cst_129 {dimension_numbers = #tpu.dot_dimension_numbers<[1], [0], [0], [1], [0, 0, 1, 1], [], []>} : vector<2x32xf32>, vector<32x128xf32>, vector<2x128xf32> -> vector<2x128xf32>
    %417 = arith.addf %415, %416 : vector<2x128xf32>
    %418 = vector.broadcast %15 : vector<1x128xf32> to vector<2x128xf32>
    %419 = arith.addf %417, %418 : vector<2x128xf32>
    %420 = math.tanh %419 : vector<2x128xf32>
    %421 = vector.extract_strided_slice %420 {offsets = [0, 0], sizes = [2, 32], strides = [1, 1]} : vector<2x128xf32> to vector<2x32xf32>
    %cst_130 = arith.constant 5.000000e-01 : f32
    %422 = vector.broadcast %cst_130 : f32 to vector<2x32xf32>
    %423 = arith.mulf %422, %421 : vector<2x32xf32>
    %cst_131 = arith.constant 5.000000e-01 : f32
    %424 = vector.broadcast %cst_131 : f32 to vector<2x32xf32>
    %425 = arith.addf %423, %424 : vector<2x32xf32>
    %426 = vector.extract_strided_slice %420 {offsets = [0, 32], sizes = [2, 32], strides = [1, 1]} : vector<2x128xf32> to vector<2x32xf32>
    %cst_132 = arith.constant 5.000000e-01 : f32
    %427 = vector.broadcast %cst_132 : f32 to vector<2x32xf32>
    %428 = arith.mulf %427, %426 : vector<2x32xf32>
    %cst_133 = arith.constant 5.000000e-01 : f32
    %429 = vector.broadcast %cst_133 : f32 to vector<2x32xf32>
    %430 = arith.addf %428, %429 : vector<2x32xf32>
    %431 = vector.extract_strided_slice %420 {offsets = [0, 64], sizes = [2, 32], strides = [1, 1]} : vector<2x128xf32> to vector<2x32xf32>
    %432 = vector.extract_strided_slice %420 {offsets = [0, 96], sizes = [2, 32], strides = [1, 1]} : vector<2x128xf32> to vector<2x32xf32>
    %cst_134 = arith.constant 5.000000e-01 : f32
    %433 = vector.broadcast %cst_134 : f32 to vector<2x32xf32>
    %434 = arith.mulf %433, %432 : vector<2x32xf32>
    %cst_135 = arith.constant 5.000000e-01 : f32
    %435 = vector.broadcast %cst_135 : f32 to vector<2x32xf32>
    %436 = arith.addf %434, %435 : vector<2x32xf32>
    %437 = arith.mulf %430, %358 : vector<2x32xf32>
    %438 = arith.mulf %425, %431 : vector<2x32xf32>
    %439 = arith.addf %437, %438 : vector<2x32xf32>
    %440 = math.tanh %439 : vector<2x32xf32>
    %441 = arith.mulf %436, %440 : vector<2x32xf32>
    %cst_136 = arith.constant dense<0.000000e+00> : vector<2x128xf32>
    %442 = tpu.matmul %441, %5, %cst_136 {dimension_numbers = #tpu.dot_dimension_numbers<[1], [0], [0], [1], [0, 0, 1, 1], [], []>} : vector<2x32xf32>, vector<32x128xf32>, vector<2x128xf32> -> vector<2x128xf32>
    %cst_137 = arith.constant dense<0.000000e+00> : vector<2x128xf32>
    %443 = tpu.matmul %387, %11, %cst_137 {dimension_numbers = #tpu.dot_dimension_numbers<[1], [0], [0], [1], [0, 0, 1, 1], [], []>} : vector<2x32xf32>, vector<32x128xf32>, vector<2x128xf32> -> vector<2x128xf32>
    %444 = arith.addf %442, %443 : vector<2x128xf32>
    %445 = vector.broadcast %17 : vector<1x128xf32> to vector<2x128xf32>
    %446 = arith.addf %444, %445 : vector<2x128xf32>
    %447 = math.tanh %446 : vector<2x128xf32>
    %448 = vector.extract_strided_slice %447 {offsets = [0, 0], sizes = [2, 32], strides = [1, 1]} : vector<2x128xf32> to vector<2x32xf32>
    %cst_138 = arith.constant 5.000000e-01 : f32
    %449 = vector.broadcast %cst_138 : f32 to vector<2x32xf32>
    %450 = arith.mulf %449, %448 : vector<2x32xf32>
    %cst_139 = arith.constant 5.000000e-01 : f32
    %451 = vector.broadcast %cst_139 : f32 to vector<2x32xf32>
    %452 = arith.addf %450, %451 : vector<2x32xf32>
    %453 = vector.extract_strided_slice %447 {offsets = [0, 32], sizes = [2, 32], strides = [1, 1]} : vector<2x128xf32> to vector<2x32xf32>
    %cst_140 = arith.constant 5.000000e-01 : f32
    %454 = vector.broadcast %cst_140 : f32 to vector<2x32xf32>
    %455 = arith.mulf %454, %453 : vector<2x32xf32>
    %cst_141 = arith.constant 5.000000e-01 : f32
    %456 = vector.broadcast %cst_141 : f32 to vector<2x32xf32>
    %457 = arith.addf %455, %456 : vector<2x32xf32>
    %458 = vector.extract_strided_slice %447 {offsets = [0, 64], sizes = [2, 32], strides = [1, 1]} : vector<2x128xf32> to vector<2x32xf32>
    %459 = vector.extract_strided_slice %447 {offsets = [0, 96], sizes = [2, 32], strides = [1, 1]} : vector<2x128xf32> to vector<2x32xf32>
    %cst_142 = arith.constant 5.000000e-01 : f32
    %460 = vector.broadcast %cst_142 : f32 to vector<2x32xf32>
    %461 = arith.mulf %460, %459 : vector<2x32xf32>
    %cst_143 = arith.constant 5.000000e-01 : f32
    %462 = vector.broadcast %cst_143 : f32 to vector<2x32xf32>
    %463 = arith.addf %461, %462 : vector<2x32xf32>
    %464 = arith.mulf %457, %385 : vector<2x32xf32>
    %465 = arith.mulf %452, %458 : vector<2x32xf32>
    %466 = arith.addf %464, %465 : vector<2x32xf32>
    %467 = math.tanh %466 : vector<2x32xf32>
    %468 = arith.mulf %463, %467 : vector<2x32xf32>
    %cst_144 = arith.constant 0.000000e+00 : f32
    %469 = vector.broadcast %cst_144 : f32 to vector<2x32xf32>
    %470 = arith.maximumf %468, %469 : vector<2x32xf32>
    %471 = arith.addf %390, %470 : vector<2x32xf32>
    %cst_145 = arith.constant dense<0.000000e+00> : vector<2x128xf32>
    %472 = tpu.matmul %414, %7, %cst_145 {dimension_numbers = #tpu.dot_dimension_numbers<[1], [0], [0], [1], [0, 0, 1, 1], [], []>} : vector<2x32xf32>, vector<32x128xf32>, vector<2x128xf32> -> vector<2x128xf32>
    %473 = arith.addf %53, %472 : vector<2x128xf32>
    %474 = math.tanh %473 : vector<2x128xf32>
    %475 = vector.extract_strided_slice %474 {offsets = [0, 0], sizes = [2, 32], strides = [1, 1]} : vector<2x128xf32> to vector<2x32xf32>
    %cst_146 = arith.constant 5.000000e-01 : f32
    %476 = vector.broadcast %cst_146 : f32 to vector<2x32xf32>
    %477 = arith.mulf %476, %475 : vector<2x32xf32>
    %cst_147 = arith.constant 5.000000e-01 : f32
    %478 = vector.broadcast %cst_147 : f32 to vector<2x32xf32>
    %479 = arith.addf %477, %478 : vector<2x32xf32>
    %480 = vector.extract_strided_slice %474 {offsets = [0, 32], sizes = [2, 32], strides = [1, 1]} : vector<2x128xf32> to vector<2x32xf32>
    %cst_148 = arith.constant 5.000000e-01 : f32
    %481 = vector.broadcast %cst_148 : f32 to vector<2x32xf32>
    %482 = arith.mulf %481, %480 : vector<2x32xf32>
    %cst_149 = arith.constant 5.000000e-01 : f32
    %483 = vector.broadcast %cst_149 : f32 to vector<2x32xf32>
    %484 = arith.addf %482, %483 : vector<2x32xf32>
    %485 = vector.extract_strided_slice %474 {offsets = [0, 64], sizes = [2, 32], strides = [1, 1]} : vector<2x128xf32> to vector<2x32xf32>
    %486 = vector.extract_strided_slice %474 {offsets = [0, 96], sizes = [2, 32], strides = [1, 1]} : vector<2x128xf32> to vector<2x32xf32>
    %cst_150 = arith.constant 5.000000e-01 : f32
    %487 = vector.broadcast %cst_150 : f32 to vector<2x32xf32>
    %488 = arith.mulf %487, %486 : vector<2x32xf32>
    %cst_151 = arith.constant 5.000000e-01 : f32
    %489 = vector.broadcast %cst_151 : f32 to vector<2x32xf32>
    %490 = arith.addf %488, %489 : vector<2x32xf32>
    %491 = arith.mulf %484, %412 : vector<2x32xf32>
    %492 = arith.mulf %479, %485 : vector<2x32xf32>
    %493 = arith.addf %491, %492 : vector<2x32xf32>
    %494 = math.tanh %493 : vector<2x32xf32>
    %495 = arith.mulf %490, %494 : vector<2x32xf32>
    %cst_152 = arith.constant dense<0.000000e+00> : vector<2x128xf32>
    %496 = tpu.matmul %495, %3, %cst_152 {dimension_numbers = #tpu.dot_dimension_numbers<[1], [0], [0], [1], [0, 0, 1, 1], [], []>} : vector<2x32xf32>, vector<32x128xf32>, vector<2x128xf32> -> vector<2x128xf32>
    %cst_153 = arith.constant dense<0.000000e+00> : vector<2x128xf32>
    %497 = tpu.matmul %441, %9, %cst_153 {dimension_numbers = #tpu.dot_dimension_numbers<[1], [0], [0], [1], [0, 0, 1, 1], [], []>} : vector<2x32xf32>, vector<32x128xf32>, vector<2x128xf32> -> vector<2x128xf32>
    %498 = arith.addf %496, %497 : vector<2x128xf32>
    %499 = vector.broadcast %15 : vector<1x128xf32> to vector<2x128xf32>
    %500 = arith.addf %498, %499 : vector<2x128xf32>
    %501 = math.tanh %500 : vector<2x128xf32>
    %502 = vector.extract_strided_slice %501 {offsets = [0, 0], sizes = [2, 32], strides = [1, 1]} : vector<2x128xf32> to vector<2x32xf32>
    %cst_154 = arith.constant 5.000000e-01 : f32
    %503 = vector.broadcast %cst_154 : f32 to vector<2x32xf32>
    %504 = arith.mulf %503, %502 : vector<2x32xf32>
    %cst_155 = arith.constant 5.000000e-01 : f32
    %505 = vector.broadcast %cst_155 : f32 to vector<2x32xf32>
    %506 = arith.addf %504, %505 : vector<2x32xf32>
    %507 = vector.extract_strided_slice %501 {offsets = [0, 32], sizes = [2, 32], strides = [1, 1]} : vector<2x128xf32> to vector<2x32xf32>
    %cst_156 = arith.constant 5.000000e-01 : f32
    %508 = vector.broadcast %cst_156 : f32 to vector<2x32xf32>
    %509 = arith.mulf %508, %507 : vector<2x32xf32>
    %cst_157 = arith.constant 5.000000e-01 : f32
    %510 = vector.broadcast %cst_157 : f32 to vector<2x32xf32>
    %511 = arith.addf %509, %510 : vector<2x32xf32>
    %512 = vector.extract_strided_slice %501 {offsets = [0, 64], sizes = [2, 32], strides = [1, 1]} : vector<2x128xf32> to vector<2x32xf32>
    %513 = vector.extract_strided_slice %501 {offsets = [0, 96], sizes = [2, 32], strides = [1, 1]} : vector<2x128xf32> to vector<2x32xf32>
    %cst_158 = arith.constant 5.000000e-01 : f32
    %514 = vector.broadcast %cst_158 : f32 to vector<2x32xf32>
    %515 = arith.mulf %514, %513 : vector<2x32xf32>
    %cst_159 = arith.constant 5.000000e-01 : f32
    %516 = vector.broadcast %cst_159 : f32 to vector<2x32xf32>
    %517 = arith.addf %515, %516 : vector<2x32xf32>
    %518 = arith.mulf %511, %439 : vector<2x32xf32>
    %519 = arith.mulf %506, %512 : vector<2x32xf32>
    %520 = arith.addf %518, %519 : vector<2x32xf32>
    %521 = math.tanh %520 : vector<2x32xf32>
    %522 = arith.mulf %517, %521 : vector<2x32xf32>
    %cst_160 = arith.constant dense<0.000000e+00> : vector<2x128xf32>
    %523 = tpu.matmul %522, %5, %cst_160 {dimension_numbers = #tpu.dot_dimension_numbers<[1], [0], [0], [1], [0, 0, 1, 1], [], []>} : vector<2x32xf32>, vector<32x128xf32>, vector<2x128xf32> -> vector<2x128xf32>
    %cst_161 = arith.constant dense<0.000000e+00> : vector<2x128xf32>
    %524 = tpu.matmul %468, %11, %cst_161 {dimension_numbers = #tpu.dot_dimension_numbers<[1], [0], [0], [1], [0, 0, 1, 1], [], []>} : vector<2x32xf32>, vector<32x128xf32>, vector<2x128xf32> -> vector<2x128xf32>
    %525 = arith.addf %523, %524 : vector<2x128xf32>
    %526 = vector.broadcast %17 : vector<1x128xf32> to vector<2x128xf32>
    %527 = arith.addf %525, %526 : vector<2x128xf32>
    %528 = math.tanh %527 : vector<2x128xf32>
    %529 = vector.extract_strided_slice %528 {offsets = [0, 0], sizes = [2, 32], strides = [1, 1]} : vector<2x128xf32> to vector<2x32xf32>
    %cst_162 = arith.constant 5.000000e-01 : f32
    %530 = vector.broadcast %cst_162 : f32 to vector<2x32xf32>
    %531 = arith.mulf %530, %529 : vector<2x32xf32>
    %cst_163 = arith.constant 5.000000e-01 : f32
    %532 = vector.broadcast %cst_163 : f32 to vector<2x32xf32>
    %533 = arith.addf %531, %532 : vector<2x32xf32>
    %534 = vector.extract_strided_slice %528 {offsets = [0, 32], sizes = [2, 32], strides = [1, 1]} : vector<2x128xf32> to vector<2x32xf32>
    %cst_164 = arith.constant 5.000000e-01 : f32
    %535 = vector.broadcast %cst_164 : f32 to vector<2x32xf32>
    %536 = arith.mulf %535, %534 : vector<2x32xf32>
    %cst_165 = arith.constant 5.000000e-01 : f32
    %537 = vector.broadcast %cst_165 : f32 to vector<2x32xf32>
    %538 = arith.addf %536, %537 : vector<2x32xf32>
    %539 = vector.extract_strided_slice %528 {offsets = [0, 64], sizes = [2, 32], strides = [1, 1]} : vector<2x128xf32> to vector<2x32xf32>
    %540 = vector.extract_strided_slice %528 {offsets = [0, 96], sizes = [2, 32], strides = [1, 1]} : vector<2x128xf32> to vector<2x32xf32>
    %cst_166 = arith.constant 5.000000e-01 : f32
    %541 = vector.broadcast %cst_166 : f32 to vector<2x32xf32>
    %542 = arith.mulf %541, %540 : vector<2x32xf32>
    %cst_167 = arith.constant 5.000000e-01 : f32
    %543 = vector.broadcast %cst_167 : f32 to vector<2x32xf32>
    %544 = arith.addf %542, %543 : vector<2x32xf32>
    %545 = arith.mulf %538, %466 : vector<2x32xf32>
    %546 = arith.mulf %533, %539 : vector<2x32xf32>
    %547 = arith.addf %545, %546 : vector<2x32xf32>
    %548 = math.tanh %547 : vector<2x32xf32>
    %549 = arith.mulf %544, %548 : vector<2x32xf32>
    %cst_168 = arith.constant 0.000000e+00 : f32
    %550 = vector.broadcast %cst_168 : f32 to vector<2x32xf32>
    %551 = arith.maximumf %549, %550 : vector<2x32xf32>
    %552 = arith.addf %471, %551 : vector<2x32xf32>
    %cst_169 = arith.constant dense<0.000000e+00> : vector<2x128xf32>
    %553 = tpu.matmul %495, %7, %cst_169 {dimension_numbers = #tpu.dot_dimension_numbers<[1], [0], [0], [1], [0, 0, 1, 1], [], []>} : vector<2x32xf32>, vector<32x128xf32>, vector<2x128xf32> -> vector<2x128xf32>
    %554 = arith.addf %59, %553 : vector<2x128xf32>
    %555 = math.tanh %554 : vector<2x128xf32>
    %556 = vector.extract_strided_slice %555 {offsets = [0, 0], sizes = [2, 32], strides = [1, 1]} : vector<2x128xf32> to vector<2x32xf32>
    %cst_170 = arith.constant 5.000000e-01 : f32
    %557 = vector.broadcast %cst_170 : f32 to vector<2x32xf32>
    %558 = arith.mulf %557, %556 : vector<2x32xf32>
    %cst_171 = arith.constant 5.000000e-01 : f32
    %559 = vector.broadcast %cst_171 : f32 to vector<2x32xf32>
    %560 = arith.addf %558, %559 : vector<2x32xf32>
    %561 = vector.extract_strided_slice %555 {offsets = [0, 32], sizes = [2, 32], strides = [1, 1]} : vector<2x128xf32> to vector<2x32xf32>
    %cst_172 = arith.constant 5.000000e-01 : f32
    %562 = vector.broadcast %cst_172 : f32 to vector<2x32xf32>
    %563 = arith.mulf %562, %561 : vector<2x32xf32>
    %cst_173 = arith.constant 5.000000e-01 : f32
    %564 = vector.broadcast %cst_173 : f32 to vector<2x32xf32>
    %565 = arith.addf %563, %564 : vector<2x32xf32>
    %566 = vector.extract_strided_slice %555 {offsets = [0, 64], sizes = [2, 32], strides = [1, 1]} : vector<2x128xf32> to vector<2x32xf32>
    %567 = vector.extract_strided_slice %555 {offsets = [0, 96], sizes = [2, 32], strides = [1, 1]} : vector<2x128xf32> to vector<2x32xf32>
    %cst_174 = arith.constant 5.000000e-01 : f32
    %568 = vector.broadcast %cst_174 : f32 to vector<2x32xf32>
    %569 = arith.mulf %568, %567 : vector<2x32xf32>
    %cst_175 = arith.constant 5.000000e-01 : f32
    %570 = vector.broadcast %cst_175 : f32 to vector<2x32xf32>
    %571 = arith.addf %569, %570 : vector<2x32xf32>
    %572 = arith.mulf %565, %493 : vector<2x32xf32>
    %573 = arith.mulf %560, %566 : vector<2x32xf32>
    %574 = arith.addf %572, %573 : vector<2x32xf32>
    %575 = math.tanh %574 : vector<2x32xf32>
    %576 = arith.mulf %571, %575 : vector<2x32xf32>
    %cst_176 = arith.constant dense<0.000000e+00> : vector<2x128xf32>
    %577 = tpu.matmul %576, %3, %cst_176 {dimension_numbers = #tpu.dot_dimension_numbers<[1], [0], [0], [1], [0, 0, 1, 1], [], []>} : vector<2x32xf32>, vector<32x128xf32>, vector<2x128xf32> -> vector<2x128xf32>
    %cst_177 = arith.constant dense<0.000000e+00> : vector<2x128xf32>
    %578 = tpu.matmul %522, %9, %cst_177 {dimension_numbers = #tpu.dot_dimension_numbers<[1], [0], [0], [1], [0, 0, 1, 1], [], []>} : vector<2x32xf32>, vector<32x128xf32>, vector<2x128xf32> -> vector<2x128xf32>
    %579 = arith.addf %577, %578 : vector<2x128xf32>
    %580 = vector.broadcast %15 : vector<1x128xf32> to vector<2x128xf32>
    %581 = arith.addf %579, %580 : vector<2x128xf32>
    %582 = math.tanh %581 : vector<2x128xf32>
    %583 = vector.extract_strided_slice %582 {offsets = [0, 0], sizes = [2, 32], strides = [1, 1]} : vector<2x128xf32> to vector<2x32xf32>
    %cst_178 = arith.constant 5.000000e-01 : f32
    %584 = vector.broadcast %cst_178 : f32 to vector<2x32xf32>
    %585 = arith.mulf %584, %583 : vector<2x32xf32>
    %cst_179 = arith.constant 5.000000e-01 : f32
    %586 = vector.broadcast %cst_179 : f32 to vector<2x32xf32>
    %587 = arith.addf %585, %586 : vector<2x32xf32>
    %588 = vector.extract_strided_slice %582 {offsets = [0, 32], sizes = [2, 32], strides = [1, 1]} : vector<2x128xf32> to vector<2x32xf32>
    %cst_180 = arith.constant 5.000000e-01 : f32
    %589 = vector.broadcast %cst_180 : f32 to vector<2x32xf32>
    %590 = arith.mulf %589, %588 : vector<2x32xf32>
    %cst_181 = arith.constant 5.000000e-01 : f32
    %591 = vector.broadcast %cst_181 : f32 to vector<2x32xf32>
    %592 = arith.addf %590, %591 : vector<2x32xf32>
    %593 = vector.extract_strided_slice %582 {offsets = [0, 64], sizes = [2, 32], strides = [1, 1]} : vector<2x128xf32> to vector<2x32xf32>
    %594 = vector.extract_strided_slice %582 {offsets = [0, 96], sizes = [2, 32], strides = [1, 1]} : vector<2x128xf32> to vector<2x32xf32>
    %cst_182 = arith.constant 5.000000e-01 : f32
    %595 = vector.broadcast %cst_182 : f32 to vector<2x32xf32>
    %596 = arith.mulf %595, %594 : vector<2x32xf32>
    %cst_183 = arith.constant 5.000000e-01 : f32
    %597 = vector.broadcast %cst_183 : f32 to vector<2x32xf32>
    %598 = arith.addf %596, %597 : vector<2x32xf32>
    %599 = arith.mulf %592, %520 : vector<2x32xf32>
    %600 = arith.mulf %587, %593 : vector<2x32xf32>
    %601 = arith.addf %599, %600 : vector<2x32xf32>
    %602 = math.tanh %601 : vector<2x32xf32>
    %603 = arith.mulf %598, %602 : vector<2x32xf32>
    %cst_184 = arith.constant dense<0.000000e+00> : vector<2x128xf32>
    %604 = tpu.matmul %603, %5, %cst_184 {dimension_numbers = #tpu.dot_dimension_numbers<[1], [0], [0], [1], [0, 0, 1, 1], [], []>} : vector<2x32xf32>, vector<32x128xf32>, vector<2x128xf32> -> vector<2x128xf32>
    %cst_185 = arith.constant dense<0.000000e+00> : vector<2x128xf32>
    %605 = tpu.matmul %549, %11, %cst_185 {dimension_numbers = #tpu.dot_dimension_numbers<[1], [0], [0], [1], [0, 0, 1, 1], [], []>} : vector<2x32xf32>, vector<32x128xf32>, vector<2x128xf32> -> vector<2x128xf32>
    %606 = arith.addf %604, %605 : vector<2x128xf32>
    %607 = vector.broadcast %17 : vector<1x128xf32> to vector<2x128xf32>
    %608 = arith.addf %606, %607 : vector<2x128xf32>
    %609 = math.tanh %608 : vector<2x128xf32>
    %610 = vector.extract_strided_slice %609 {offsets = [0, 0], sizes = [2, 32], strides = [1, 1]} : vector<2x128xf32> to vector<2x32xf32>
    %cst_186 = arith.constant 5.000000e-01 : f32
    %611 = vector.broadcast %cst_186 : f32 to vector<2x32xf32>
    %612 = arith.mulf %611, %610 : vector<2x32xf32>
    %cst_187 = arith.constant 5.000000e-01 : f32
    %613 = vector.broadcast %cst_187 : f32 to vector<2x32xf32>
    %614 = arith.addf %612, %613 : vector<2x32xf32>
    %615 = vector.extract_strided_slice %609 {offsets = [0, 32], sizes = [2, 32], strides = [1, 1]} : vector<2x128xf32> to vector<2x32xf32>
    %cst_188 = arith.constant 5.000000e-01 : f32
    %616 = vector.broadcast %cst_188 : f32 to vector<2x32xf32>
    %617 = arith.mulf %616, %615 : vector<2x32xf32>
    %cst_189 = arith.constant 5.000000e-01 : f32
    %618 = vector.broadcast %cst_189 : f32 to vector<2x32xf32>
    %619 = arith.addf %617, %618 : vector<2x32xf32>
    %620 = vector.extract_strided_slice %609 {offsets = [0, 64], sizes = [2, 32], strides = [1, 1]} : vector<2x128xf32> to vector<2x32xf32>
    %621 = vector.extract_strided_slice %609 {offsets = [0, 96], sizes = [2, 32], strides = [1, 1]} : vector<2x128xf32> to vector<2x32xf32>
    %cst_190 = arith.constant 5.000000e-01 : f32
    %622 = vector.broadcast %cst_190 : f32 to vector<2x32xf32>
    %623 = arith.mulf %622, %621 : vector<2x32xf32>
    %cst_191 = arith.constant 5.000000e-01 : f32
    %624 = vector.broadcast %cst_191 : f32 to vector<2x32xf32>
    %625 = arith.addf %623, %624 : vector<2x32xf32>
    %626 = arith.mulf %619, %547 : vector<2x32xf32>
    %627 = arith.mulf %614, %620 : vector<2x32xf32>
    %628 = arith.addf %626, %627 : vector<2x32xf32>
    %629 = math.tanh %628 : vector<2x32xf32>
    %630 = arith.mulf %625, %629 : vector<2x32xf32>
    %cst_192 = arith.constant 0.000000e+00 : f32
    %631 = vector.broadcast %cst_192 : f32 to vector<2x32xf32>
    %632 = arith.maximumf %630, %631 : vector<2x32xf32>
    %633 = arith.addf %552, %632 : vector<2x32xf32>
    %cst_193 = arith.constant dense<0.000000e+00> : vector<2x128xf32>
    %634 = tpu.matmul %576, %7, %cst_193 {dimension_numbers = #tpu.dot_dimension_numbers<[1], [0], [0], [1], [0, 0, 1, 1], [], []>} : vector<2x32xf32>, vector<32x128xf32>, vector<2x128xf32> -> vector<2x128xf32>
    %635 = arith.addf %65, %634 : vector<2x128xf32>
    %636 = math.tanh %635 : vector<2x128xf32>
    %637 = vector.extract_strided_slice %636 {offsets = [0, 0], sizes = [2, 32], strides = [1, 1]} : vector<2x128xf32> to vector<2x32xf32>
    %cst_194 = arith.constant 5.000000e-01 : f32
    %638 = vector.broadcast %cst_194 : f32 to vector<2x32xf32>
    %639 = arith.mulf %638, %637 : vector<2x32xf32>
    %cst_195 = arith.constant 5.000000e-01 : f32
    %640 = vector.broadcast %cst_195 : f32 to vector<2x32xf32>
    %641 = arith.addf %639, %640 : vector<2x32xf32>
    %642 = vector.extract_strided_slice %636 {offsets = [0, 32], sizes = [2, 32], strides = [1, 1]} : vector<2x128xf32> to vector<2x32xf32>
    %cst_196 = arith.constant 5.000000e-01 : f32
    %643 = vector.broadcast %cst_196 : f32 to vector<2x32xf32>
    %644 = arith.mulf %643, %642 : vector<2x32xf32>
    %cst_197 = arith.constant 5.000000e-01 : f32
    %645 = vector.broadcast %cst_197 : f32 to vector<2x32xf32>
    %646 = arith.addf %644, %645 : vector<2x32xf32>
    %647 = vector.extract_strided_slice %636 {offsets = [0, 64], sizes = [2, 32], strides = [1, 1]} : vector<2x128xf32> to vector<2x32xf32>
    %648 = vector.extract_strided_slice %636 {offsets = [0, 96], sizes = [2, 32], strides = [1, 1]} : vector<2x128xf32> to vector<2x32xf32>
    %cst_198 = arith.constant 5.000000e-01 : f32
    %649 = vector.broadcast %cst_198 : f32 to vector<2x32xf32>
    %650 = arith.mulf %649, %648 : vector<2x32xf32>
    %cst_199 = arith.constant 5.000000e-01 : f32
    %651 = vector.broadcast %cst_199 : f32 to vector<2x32xf32>
    %652 = arith.addf %650, %651 : vector<2x32xf32>
    %653 = arith.mulf %646, %574 : vector<2x32xf32>
    %654 = arith.mulf %641, %647 : vector<2x32xf32>
    %655 = arith.addf %653, %654 : vector<2x32xf32>
    %656 = math.tanh %655 : vector<2x32xf32>
    %657 = arith.mulf %652, %656 : vector<2x32xf32>
    %cst_200 = arith.constant dense<0.000000e+00> : vector<2x128xf32>
    %658 = tpu.matmul %657, %3, %cst_200 {dimension_numbers = #tpu.dot_dimension_numbers<[1], [0], [0], [1], [0, 0, 1, 1], [], []>} : vector<2x32xf32>, vector<32x128xf32>, vector<2x128xf32> -> vector<2x128xf32>
    %cst_201 = arith.constant dense<0.000000e+00> : vector<2x128xf32>
    %659 = tpu.matmul %603, %9, %cst_201 {dimension_numbers = #tpu.dot_dimension_numbers<[1], [0], [0], [1], [0, 0, 1, 1], [], []>} : vector<2x32xf32>, vector<32x128xf32>, vector<2x128xf32> -> vector<2x128xf32>
    %660 = arith.addf %658, %659 : vector<2x128xf32>
    %661 = vector.broadcast %15 : vector<1x128xf32> to vector<2x128xf32>
    %662 = arith.addf %660, %661 : vector<2x128xf32>
    %663 = math.tanh %662 : vector<2x128xf32>
    %664 = vector.extract_strided_slice %663 {offsets = [0, 0], sizes = [2, 32], strides = [1, 1]} : vector<2x128xf32> to vector<2x32xf32>
    %cst_202 = arith.constant 5.000000e-01 : f32
    %665 = vector.broadcast %cst_202 : f32 to vector<2x32xf32>
    %666 = arith.mulf %665, %664 : vector<2x32xf32>
    %cst_203 = arith.constant 5.000000e-01 : f32
    %667 = vector.broadcast %cst_203 : f32 to vector<2x32xf32>
    %668 = arith.addf %666, %667 : vector<2x32xf32>
    %669 = vector.extract_strided_slice %663 {offsets = [0, 32], sizes = [2, 32], strides = [1, 1]} : vector<2x128xf32> to vector<2x32xf32>
    %cst_204 = arith.constant 5.000000e-01 : f32
    %670 = vector.broadcast %cst_204 : f32 to vector<2x32xf32>
    %671 = arith.mulf %670, %669 : vector<2x32xf32>
    %cst_205 = arith.constant 5.000000e-01 : f32
    %672 = vector.broadcast %cst_205 : f32 to vector<2x32xf32>
    %673 = arith.addf %671, %672 : vector<2x32xf32>
    %674 = vector.extract_strided_slice %663 {offsets = [0, 64], sizes = [2, 32], strides = [1, 1]} : vector<2x128xf32> to vector<2x32xf32>
    %675 = vector.extract_strided_slice %663 {offsets = [0, 96], sizes = [2, 32], strides = [1, 1]} : vector<2x128xf32> to vector<2x32xf32>
    %cst_206 = arith.constant 5.000000e-01 : f32
    %676 = vector.broadcast %cst_206 : f32 to vector<2x32xf32>
    %677 = arith.mulf %676, %675 : vector<2x32xf32>
    %cst_207 = arith.constant 5.000000e-01 : f32
    %678 = vector.broadcast %cst_207 : f32 to vector<2x32xf32>
    %679 = arith.addf %677, %678 : vector<2x32xf32>
    %680 = arith.mulf %673, %601 : vector<2x32xf32>
    %681 = arith.mulf %668, %674 : vector<2x32xf32>
    %682 = arith.addf %680, %681 : vector<2x32xf32>
    %683 = math.tanh %682 : vector<2x32xf32>
    %684 = arith.mulf %679, %683 : vector<2x32xf32>
    %cst_208 = arith.constant dense<0.000000e+00> : vector<2x128xf32>
    %685 = tpu.matmul %684, %5, %cst_208 {dimension_numbers = #tpu.dot_dimension_numbers<[1], [0], [0], [1], [0, 0, 1, 1], [], []>} : vector<2x32xf32>, vector<32x128xf32>, vector<2x128xf32> -> vector<2x128xf32>
    %cst_209 = arith.constant dense<0.000000e+00> : vector<2x128xf32>
    %686 = tpu.matmul %630, %11, %cst_209 {dimension_numbers = #tpu.dot_dimension_numbers<[1], [0], [0], [1], [0, 0, 1, 1], [], []>} : vector<2x32xf32>, vector<32x128xf32>, vector<2x128xf32> -> vector<2x128xf32>
    %687 = arith.addf %685, %686 : vector<2x128xf32>
    %688 = vector.broadcast %17 : vector<1x128xf32> to vector<2x128xf32>
    %689 = arith.addf %687, %688 : vector<2x128xf32>
    %690 = math.tanh %689 : vector<2x128xf32>
    %691 = vector.extract_strided_slice %690 {offsets = [0, 0], sizes = [2, 32], strides = [1, 1]} : vector<2x128xf32> to vector<2x32xf32>
    %cst_210 = arith.constant 5.000000e-01 : f32
    %692 = vector.broadcast %cst_210 : f32 to vector<2x32xf32>
    %693 = arith.mulf %692, %691 : vector<2x32xf32>
    %cst_211 = arith.constant 5.000000e-01 : f32
    %694 = vector.broadcast %cst_211 : f32 to vector<2x32xf32>
    %695 = arith.addf %693, %694 : vector<2x32xf32>
    %696 = vector.extract_strided_slice %690 {offsets = [0, 32], sizes = [2, 32], strides = [1, 1]} : vector<2x128xf32> to vector<2x32xf32>
    %cst_212 = arith.constant 5.000000e-01 : f32
    %697 = vector.broadcast %cst_212 : f32 to vector<2x32xf32>
    %698 = arith.mulf %697, %696 : vector<2x32xf32>
    %cst_213 = arith.constant 5.000000e-01 : f32
    %699 = vector.broadcast %cst_213 : f32 to vector<2x32xf32>
    %700 = arith.addf %698, %699 : vector<2x32xf32>
    %701 = vector.extract_strided_slice %690 {offsets = [0, 64], sizes = [2, 32], strides = [1, 1]} : vector<2x128xf32> to vector<2x32xf32>
    %702 = vector.extract_strided_slice %690 {offsets = [0, 96], sizes = [2, 32], strides = [1, 1]} : vector<2x128xf32> to vector<2x32xf32>
    %cst_214 = arith.constant 5.000000e-01 : f32
    %703 = vector.broadcast %cst_214 : f32 to vector<2x32xf32>
    %704 = arith.mulf %703, %702 : vector<2x32xf32>
    %cst_215 = arith.constant 5.000000e-01 : f32
    %705 = vector.broadcast %cst_215 : f32 to vector<2x32xf32>
    %706 = arith.addf %704, %705 : vector<2x32xf32>
    %707 = arith.mulf %700, %628 : vector<2x32xf32>
    %708 = arith.mulf %695, %701 : vector<2x32xf32>
    %709 = arith.addf %707, %708 : vector<2x32xf32>
    %710 = math.tanh %709 : vector<2x32xf32>
    %711 = arith.mulf %706, %710 : vector<2x32xf32>
    %cst_216 = arith.constant 0.000000e+00 : f32
    %712 = vector.broadcast %cst_216 : f32 to vector<2x32xf32>
    %713 = arith.maximumf %711, %712 : vector<2x32xf32>
    %714 = arith.addf %633, %713 : vector<2x32xf32>
    %c0_217 = arith.constant 0 : index
    %c0_218 = arith.constant 0 : index
    %715 = vector.load %arg5[%c0_217, %c0_218] : memref<2x32xf32, #tpu.memory_space<vmem>>, vector<2x32xf32>
    tpu.vector_store %arg5[%c0_217, %c0_218], %714 {strides = array<i32>} : memref<2x32xf32, #tpu.memory_space<vmem>>, vector<2x32xf32>,
    return
  }
}

</mosaic_0001>

<bundles_post_ra>
// kernel: tpu_custom_call.1
= control target key start
LH: loop header
LB: loop body
LE: loop exit
PB: predicated region body
PF: predicated region fallthrough
CT: control target
= control target key end

     0   :  { %10 = vsyncpa [#allocation3], 0  ;;  %s2494_s0 = inlined_call_operand.hbm [shape: f32[2,8], index: 0, kind: input, shape index: {}]   ;;  %s2495_s1 = inlined_call_operand.hbm [shape: f32[1,128], index: 1, kind: input, shape index: {}]   ;;  %s2496_s2 = inlined_call_operand.hbm [shape: f32[2,32,128], index: 2, kind: input, shape index: {}]   ;;  %s2497_s3 = inlined_call_operand.hbm [shape: f32[3,32,128], index: 3, kind: input, shape index: {}]   ;;  %s2498_s4 = inlined_call_operand.vmem [shape: f32[3,1,128], index: 4, kind: input, shape index: {}]   ;;  %s2499_s5 = inlined_call_operand.hbm [shape: f32[2,32], index: 5, kind: output, shape index: {}]  }
   0x1   :  { %11 = vsyncpa [#allocation6], 0 }
   0x2   :  { %12 = vsyncpa [#allocation9], 0  ;;  %s30_s20 = sshll.u32 %s2495_s1, 4  ;;  %s31_s20 = int_to_ptr.hbm [resolvable:$true] %s30_s20 }
   0x3   :  { %13 = vsyncpa [#allocation4], 0  ;;  %s1949_s21 = smov [#allocation5]   ;;  %s19_s25 = sshll.u32 %s2494_s0, 4  ;;  %s20_s25 = int_to_ptr.hbm [resolvable:$true] %s19_s25 }
   0x4   :  { %s32_s22 = sshll.u32 %s1949_s21, 4  ;;  %s1950_s26 = smov [#allocation2]   ;;  %s33_s22 = int_to_ptr.vmem [resolvable:$true] %s32_s22 }
   0x5   :  { %35 = dma.hbm_to_vmem [thread:$0]  %s31_s20, 16, %s33_s22, [#allocation6]  }
   0x6   :  { %s21_s27 = sshll.u32 %s1950_s26, 4  ;;  %s40_s30 = sshll.u32 %s2496_s2, 4  ;;  %s22_s27 = int_to_ptr.vmem [resolvable:$true] %s21_s27  ;;  %s41_s30 = int_to_ptr.hbm [resolvable:$true] %s40_s30 }
   0x7   :  { %24 = dma.hbm_to_vmem [thread:$0]  %s20_s25, 32, %s22_s27, [#allocation3]  }
   0x8   :  { %s1951_s1 = smov [#allocation7]   ;;  %s53_s9 = sshll.u32 %s2497_s3, 4  ;;  %s54_s9 = int_to_ptr.hbm [resolvable:$true] %s53_s9 }
   0x9   :  { %s42_s6 = sshll.u32 %s1951_s1, 4  ;;  %s1952_s10 = smov 128   ;;  %s43_s6 = int_to_ptr.vmem [resolvable:$true] %s42_s6 }
   0xa   :  { %s1953_s0 = smov 8   ;;  %s1954_s11 = smov [#allocation8]  }
   0xb   :  { %48 = dma.hbm_to_vmem [thread:$0]  %s41_s30, 1024, %s43_s6, [#allocation6], %s1952_s10, %s1952_s10, %s1953_s0  }
   0xc   :  { %s55_s12 = sshll.u32 %s1954_s11, 4  ;;  %s56_s12 = int_to_ptr.vmem [resolvable:$true] %s55_s12 }
   0xd   :  { %61 = dma.hbm_to_vmem [thread:$0]  %s54_s9, 1536, %s56_s12, [#allocation9], %s1952_s10, %s1952_s10, %s1953_s0  }
   0xe   :  { %1941 = dma.done.wait [#allocation3], 32  }
   0xf   :  { %1942 = vsyncadd [#allocation3], 4294967264 }
  0x10   :  { %1943 = dma.done.wait [#allocation6], 1040  }
  0x11   :  { %1944 = vsyncadd [#allocation6], 4294966256 }
  0x12   :  { %1945 = dma.done.wait [#allocation9], 1536  }
  0x13   :  { %1946 = vsyncadd [#allocation9], 4294965760  ;;  %v1955_v0 = vmov 0   ;;  %v2009_v1 = vld [vmem:[#allocation8 + $0x18] sm:$0xff]  ;;  %v2011_v2 = vld [vmem:[#allocation8 + $0x10] sm:$0xff]  ;;  %v1956_v6 = vmov 0.0  }
  0x14   :  { %1692 = vset.pattern.permute.xlu0 %v1955_v0  ;;  %181 = vmatpush.msra.mxu0 %v2009_v1  ;;  %v2014_v3 = vld [vmem:[#allocation2] sm:$0x3]  ;;  %v2016_v4 = vld [vmem:[#allocation8 + $0x8] sm:$0xff]  ;;  %v2020_v5 = vld [vmem:[#allocation8] sm:$0xff]  ;;  %s1957_s13 = smov 64   ;;  %s1958_s14 = smov 32  }
  0x15   :  { %112 = vperm.xlu0 %1692, %v2014_v3   ;;  %v2025_v7 = vld [vmem:[#allocation5] ss:$0 sm:$0xff]  ;;  %v2031_v10 = vld [vmem:[%s2498_s4] ss:$0 sm:$0xff]  ;;  %v2042_v24 = vld [vmem:[#allocation8 + $0x30] sm:$0xff]  ;;  %v1959_v33 = vmov 1  }
  0x16   :  { %182 = vmatpush.msra.mxu0 %v2011_v2  ;;  %v2040_v23 = vld [vmem:[#allocation8 + $0x38] sm:$0xff]  ;;  %v2047_v26 = vld [vmem:[#allocation7 + $0x10] sm:$0xff]  ;;  %v2049_v27 = vld [vmem:[#allocation8 + $0x28] sm:$0xff]  ;;  %1693 = vset.pattern.permute.xlu2 %v1959_v33  ;;  %vm165_vm0 = vcmask 261120   ;;  %s1623_s28 = sshll.u32 %s2499_s5, 4  ;;  %vm1614_vm1 = vcmask 254976   ;;  %s1624_s28 = int_to_ptr.hbm [resolvable:$true] %s1623_s28 }
  0x17   :  { %222 = vmatpush.msra.mxu1 %v2040_v23  ;;  %v2045_v25 = vld [vmem:[#allocation7 + $0x18] sm:$0xff]  ;;  %v2053_v28 = vld [vmem:[#allocation7 + $0x8] sm:$0xff]  ;;  %v2055_v29 = vld [vmem:[#allocation8 + $0x20] sm:$0xff] }
  0x18   :  { %183 = vmatpush.msra.mxu0 %v2016_v4  ;;  %247 = vmatpush.msra.mxu2 %v2045_v25  ;;  %v2059_v30 = vld [vmem:[#allocation7] sm:$0xff]  ;;  %v2086_v41 = vld [vmem:[%s2498_s4 + $0x1] ss:$0 sm:$0xff]  ;;  %v2104_v0 = vld [vmem:[#allocation8 + $0x50] sm:$0xff] }
  0x19   :  { %223 = vmatpush.msra.mxu1 %v2042_v24  ;;  %v2102_v63 = vld [vmem:[#allocation8 + $0x58] sm:$0xff] }
  0x1a   :  { %184 = vmatpush.msra.mxu0 %v2020_v5  ;;  %248 = vmatpush.msra.mxu2 %v2047_v26 }
  0x1b   :  { %185 = vmatmul.f32.vlgmr.msra.gmra.mxu0 %v1956_v6  ;;  %224 = vmatpush.msra.mxu1 %v2049_v27 }
  0x1c   :  { %249 = vmatpush.msra.mxu2 %v2053_v28  ;;  %291 = vmatpush.msra.mxu3 %v2102_v63 }
  0x1d   :  { %225 = vmatpush.msra.mxu1 %v2055_v29 }
  0x1e   :  { %226 = vmatmul.f32.vlgmr.msra.gmra.mxu1 %v1956_v6  ;;  %250 = vmatpush.msra.mxu2 %v2059_v30 }
  0x1f   :  { %362 = vmatpush.msrb.mxu1 %v2009_v1  ;;  %292 = vmatpush.msra.mxu3 %v2104_v0 }
  0x20   :  { %403 = vmatpush.msrb.mxu2 %v2040_v23 }
  0x21   :  { %363 = vmatpush.msrb.mxu1 %v2011_v2 }
  0x22   :  { %404 = vmatpush.msrb.mxu2 %v2042_v24 }
  0x23   :  { %364 = vmatpush.msrb.mxu1 %v2016_v4 }
  0x24   :  { %405 = vmatpush.msrb.mxu2 %v2049_v27 }
  0x25   :  { %365 = vmatpush.msrb.mxu1 %v2020_v5 }
  0x26   :  { %406 = vmatpush.msrb.mxu2 %v2055_v29 }
  0x87   :  { %v113_v8 = vpop.permute.xlu0 %112 }
  0x88   :  { %v118_v9 = vmul.f32 %v2025_v7, %v113_v8  ;;  %v2107_v8 = vld [vmem:[#allocation8 + $0x48] sm:$0xff] }
  0x89   :  { %293 = vmatpush.msra.mxu3 %v2107_v8 }
  0x8a   :  { %v122_v11 = vadd.f32 %v2031_v10, %v118_v9  ;;  %v2110_v9 = vld [vmem:[#allocation8 + $0x40] sm:$0xff] }
  0x8b   :  { %294 = vmatpush.msra.mxu3 %v2110_v9 }
  0x8c   :  { %295 = vmatmul.f32.vlgmr.msra.gmra.mxu3 %v1956_v6 }
  0x8d   :  { %428 = vmatpush.msrb.mxu3 %v2045_v25 }
  0x8f   :  { %429 = vmatpush.msrb.mxu3 %v2047_v26 }
  0x91   :  { %430 = vmatpush.msrb.mxu3 %v2053_v28 }
  0x93   :  { %431 = vmatpush.msrb.mxu3 %v2059_v30 }
  0x95   :  { %583 = vmatpush.msra.mxu3 %v2040_v23 }
  0x97   :  { %584 = vmatpush.msra.mxu3 %v2042_v24 }
  0x98   :  { %v186_v12 = vpop.f32.mrf.mxu0 }
  0x99   :  { %v189_v13 = vadd.f32 %v186_v12, %v122_v11  ;;  %585 = vmatpush.msra.mxu3 %v2049_v27 }
  0x9b   :  { %1704 = vtanh.f32 %v189_v13  ;;  %v227_v35 = vpop.f32.mrf.mxu1  ;;  %586 = vmatpush.msra.mxu3 %v2055_v29 }
  0xa1   :  { %v1705_v14 = vpop.eup %1704 }
  0xa2   :  { %195 = vrot.lane.b32.xlu0 %v1705_v14, %s1957_s13  ;;  %v191_v15 = vmul.f32 0.5, %v1705_v14  ;;  %v2125_v14 = vld [vmem:[#allocation7 + $0x38] sm:$0xff] }
  0xa3   :  { %316 = vmatpush.msrb.mxu0 %v2125_v14  ;;  %499 = vmatpush.msra.mxu1 %v2125_v14 }
  0xa4   :  { %v192_v16 = vadd.f32 0.5, %v191_v15  ;;  %v2127_v15 = vld [vmem:[#allocation7 + $0x30] sm:$0xff] }
  0xa5   :  { %317 = vmatpush.msrb.mxu0 %v2127_v15  ;;  %500 = vmatpush.msra.mxu1 %v2127_v15 }
  0xa6   :  { %v193_v19 = vmul.f32 0.0, %v192_v16 }
 0x114   :  { %v196_v17 = vpop.permute.xlu0 %195 }
 0x115   :  { %v198_v18 = vmul.f32 %v196_v17, %v192_v16  ;;  %v2135_v17 = vld [vmem:[#allocation7 + $0x20] sm:$0xff] }
 0x117   :  { %200 = vrot.lane.b32.xlu1 %v198_v18, %s1958_s14  ;;  %v1960_v18 = vmov 2  }
 0x189   :  { %v201_v20 = vpop.permute.xlu1 %200 }
 0x18a   :  { %v2036_v21 = vadd.f32 %v201_v20, %v193_v19 }
 0x18c   :  { %1706 = vtanh.f32 %v2036_v21 }
 0x192   :  { %v1707_v22 = vpop.eup %1706 }
 0x193   :  { %206 = vrot.lane.b32.xlu1 %v1707_v22, %s1957_s13  ;;  %v2173_v22 = vld [vmem:[%s2498_s4 + $0x2] ss:$0 sm:$0xff] }
 0x205   :  { %v207_v31 = vpop.permute.xlu1 %206 }
 0x206   :  { %v209_v32 = vmul.f32 %v207_v31, %v192_v16  ;;  %v2131_v16 = vld [vmem:[#allocation7 + $0x28] sm:$0xff] }
 0x207   :  { %318 = vmatpush.msrb.mxu0 %v2131_v16  ;;  %501 = vmatpush.msra.mxu1 %v2131_v16 }
 0x208   :  { %231 = vrot.lane.b32.xlu2 %v209_v32, %s1958_s14 }
 0x209   :  { %319 = vmatpush.msrb.mxu0 %v2135_v17  ;;  %502 = vmatpush.msra.mxu1 %v2135_v17 }
 0x20b   :  { %474 = vmatpush.msra.mxu0 %v2102_v63 }
 0x20d   :  { %475 = vmatpush.msra.mxu0 %v2104_v0 }
 0x20f   :  { %476 = vmatpush.msra.mxu0 %v2107_v8 }
 0x210   :  { %124 = vperm.xlu2 %1693, %v2014_v3  }
 0x211   :  { %477 = vmatpush.msra.mxu0 %v2110_v9 }
 0x218   :  { %1694 = vset.pattern.permute.xlu2 %v1960_v18 }
 0x262   :  { %v232_v34 = vpop.permute.xlu2 %231 }
 0x263   :  { %1637 = vmatmul.msk.f32.vlgmr.msra.gmra.mxu2 %vm165_vm0, %v232_v34  ;;  %1639 = vmatmul.msk.f32.vlgmr.msrb.gmra.mxu1 %vm165_vm0, %v232_v34 }
 0x264   :  { %542 = vmatpush.msra.mxu2 %v2009_v1  ;;  %654 = vmatpush.msrb.mxu1 %v2102_v63 }
 0x266   :  { %543 = vmatpush.msra.mxu2 %v2011_v2  ;;  %655 = vmatpush.msrb.mxu1 %v2104_v0 }
 0x268   :  { %544 = vmatpush.msra.mxu2 %v2016_v4  ;;  %656 = vmatpush.msrb.mxu1 %v2107_v8 }
 0x26a   :  { %545 = vmatpush.msra.mxu2 %v2020_v5  ;;  %v125_v36 = vpop.permute.xlu2 %124  ;;  %657 = vmatpush.msrb.mxu1 %v2110_v9 }
 0x26b   :  { %v127_v37 = vmul.f32 %v2025_v7, %v125_v36 }
 0x26d   :  { %v128_v38 = vadd.f32 %v2031_v10, %v127_v37 }
 0x2e0   :  { %v367_v39 = vpop.f32.mrf.mxu1 }
 0x2e1   :  { %v370_v40 = vadd.f32 %v367_v39, %v128_v38 }
 0x2e3   :  { %1708 = vtanh.f32 %v370_v40 }
 0x2e6   :  { %v252_v42 = vpop.f32.mrf.mxu2 }
 0x2e7   :  { %v253_v43 = vadd.f32 %v252_v42, %v227_v35 }
 0x2e9   :  { %v1709_v44 = vpop.eup %1708  ;;  %v258_v45 = vadd.f32 %v2086_v41, %v253_v43 }
 0x2ea   :  { %376 = vrot.lane.b32.xlu1 %v1709_v44, %s1957_s13  ;;  %v372_v47 = vmul.f32 0.5, %v1709_v44 }
 0x2eb   :  { %1710 = vtanh.f32 %v258_v45 }
 0x2ec   :  { %v373_v48 = vadd.f32 0.5, %v372_v47 }
 0x2ee   :  { %v374_v59 = vmul.f32 %v373_v48, %v2036_v21  ;;  %v296_v21 = vpop.f32.mrf.mxu3 }
 0x2f1   :  { %v1711_v46 = vpop.eup %1710 }
 0x2f2   :  { %264 = vrot.lane.b32.xlu0 %v1711_v46, %s1957_s13  ;;  %v260_v51 = vmul.f32 0.5, %v1711_v46 }
 0x2f4   :  { %v261_v52 = vadd.f32 0.5, %v260_v51 }
 0x2f6   :  { %v262_v55 = vmul.f32 0.0, %v261_v52 }
 0x35c   :  { %v377_v49 = vpop.permute.xlu1 %376 }
 0x35d   :  { %v379_v50 = vmul.f32 %v377_v49, %v373_v48 }
 0x35f   :  { %381 = vrot.lane.b32.xlu0 %v379_v50, %s1958_s14 }
 0x364   :  { %v265_v53 = vpop.permute.xlu0 %264 }
 0x365   :  { %v267_v54 = vmul.f32 %v265_v53, %v261_v52 }
 0x367   :  { %269 = vrot.lane.b32.xlu2 %v267_v54, %s1958_s14 }
 0x3c1   :  { %v270_v56 = vpop.permute.xlu2 %269 }
 0x3c2   :  { %v2093_v57 = vadd.f32 %v270_v56, %v262_v55 }
 0x3c4   :  { %1712 = vtanh.f32 %v2093_v57 }
 0x3ca   :  { %v1713_v58 = vpop.eup %1712 }
 0x3cb   :  { %275 = vrot.lane.b32.xlu1 %v1713_v58, %s1957_s13 }
 0x3d1   :  { %v382_v60 = vpop.permute.xlu0 %381 }
 0x3d2   :  { %v2098_v61 = vadd.f32 %v382_v60, %v374_v59 }
 0x3d4   :  { %1714 = vtanh.f32 %v2098_v61 }
 0x3da   :  { %v1715_v62 = vpop.eup %1714 }
 0x3db   :  { %387 = vrot.lane.b32.xlu2 %v1715_v62, %s1957_s13 }
 0x3e3   :  { %130 = vperm.xlu2 %1694, %v2014_v3  }
 0x435   :  { %v388_v11 = vpop.permute.xlu2 %387 }
 0x436   :  { %v390_v12 = vmul.f32 %v388_v11, %v373_v48 }
 0x438   :  { %412 = vrot.lane.b32.xlu1 %v390_v12, %s1958_s14 }
 0x43d   :  { %v276_v6 = vpop.permute.xlu1 %275  ;;  %v131_v34 = vpop.permute.xlu2 %130 }
 0x43e   :  { %v278_v13 = vmul.f32 %v276_v6, %v261_v52  ;;  %v133_v38 = vmul.f32 %v2025_v7, %v131_v34 }
 0x440   :  { %300 = vrot.lane.b32.xlu0 %v278_v13, %s1958_s14  ;;  %v134_v42 = vadd.f32 %v2031_v10, %v133_v38 }
 0x4aa   :  { %v413_v19 = vpop.permute.xlu1 %412 }
 0x4ab   :  { %1641 = vmatmul.msk.f32.vlgmr.msrb.gmra.mxu3 %vm165_vm0, %v413_v19 }
 0x4ac   :  { %722 = vmatpush.msrb.mxu3 %v2009_v1 }
 0x4ae   :  { %723 = vmatpush.msrb.mxu3 %v2011_v2 }
 0x4b0   :  { %724 = vmatpush.msrb.mxu3 %v2016_v4 }
 0x4b2   :  { %v301_v20 = vpop.permute.xlu0 %300  ;;  %725 = vmatpush.msrb.mxu3 %v2020_v5 }
 0x4b3   :  { %1638 = vmatmul.msk.f32.vlgmr.msrb.gmra.mxu0 %vm165_vm0, %v301_v20  ;;  %1640 = vmatmul.msk.f32.vlgmr.msrb.gmra.mxu2 %vm165_vm0, %v301_v20 }
 0x4b4   :  { %608 = vmatpush.msrb.mxu0 %v2045_v25  ;;  %679 = vmatpush.msrb.mxu2 %v2125_v14 }
 0x4b6   :  { %609 = vmatpush.msrb.mxu0 %v2047_v26  ;;  %680 = vmatpush.msrb.mxu2 %v2127_v15 }
 0x4b8   :  { %610 = vmatpush.msrb.mxu0 %v2053_v28  ;;  %681 = vmatpush.msrb.mxu2 %v2131_v16 }
 0x4ba   :  { %611 = vmatpush.msrb.mxu0 %v2059_v30  ;;  %682 = vmatpush.msrb.mxu2 %v2135_v17 }
 0x4bb   :  { %1644 = vmatmul.msk.f32.vlgmr.msra.gmra.mxu2 %vm165_vm0, %v413_v19 }
 0x4bc   :  { %834 = vmatpush.msra.mxu2 %v2102_v63 }
 0x4be   :  { %835 = vmatpush.msra.mxu2 %v2104_v0 }
 0x4c0   :  { %836 = vmatpush.msra.mxu2 %v2107_v8 }
 0x4c2   :  { %837 = vmatpush.msra.mxu2 %v2110_v9 }
 0x52e   :  { %v433_v35 = vpop.f32.mrf.mxu3 }
 0x530   :  { %v321_v31 = vpop.f32.mrf.mxu0 }
 0x531   :  { %v322_v32 = vadd.f32 %v321_v31, %v296_v21 }
 0x533   :  { %v327_v33 = vadd.f32 %v2173_v22, %v322_v32 }
 0x535   :  { %1716 = vtanh.f32 %v327_v33 }
 0x536   :  { %v408_v36 = vpop.f32.mrf.mxu2 }
 0x537   :  { %v434_v37 = vadd.f32 %v433_v35, %v408_v36 }
 0x539   :  { %v436_v39 = vadd.f32 %v2086_v41, %v434_v37  ;;  %v1961_v37 = vmov 3  }
 0x53a   :  { %1695 = vset.pattern.permute.xlu0 %v1961_v37 }
 0x53b   :  { %v1717_v40 = vpop.eup %1716  ;;  %1718 = vtanh.f32 %v436_v39 }
 0x53c   :  { %333 = vrot.lane.b32.xlu0 %v1717_v40, %s1957_s13  ;;  %v329_v51 = vmul.f32 0.5, %v1717_v40 }
 0x53e   :  { %v547_v43 = vpop.f32.mrf.mxu2  ;;  %v330_v52 = vadd.f32 0.5, %v329_v51 }
 0x53f   :  { %v550_v44 = vadd.f32 %v547_v43, %v134_v42 }
 0x540   :  { %v331_v6 = vmul.f32 0.0, %v330_v52 }
 0x541   :  { %v1719_v45 = vpop.eup %1718  ;;  %1720 = vtanh.f32 %v550_v44 }
 0x542   :  { %442 = vrot.lane.b32.xlu1 %v1719_v45, %s1957_s13  ;;  %v438_v55 = vmul.f32 0.5, %v1719_v45 }
 0x544   :  { %v439_v56 = vadd.f32 0.5, %v438_v55 }
 0x546   :  { %v440_v19 = vmul.f32 %v439_v56, %v2093_v57 }
 0x547   :  { %v1721_v46 = vpop.eup %1720 }
 0x548   :  { %556 = vrot.lane.b32.xlu2 %v1721_v46, %s1957_s13  ;;  %v552_v47 = vmul.f32 0.5, %v1721_v46 }
 0x54a   :  { %v553_v48 = vadd.f32 0.5, %v552_v47 }
 0x54c   :  { %v554_v60 = vmul.f32 %v553_v48, %v2098_v61 }
 0x5a2   :  { %v557_v49 = vpop.permute.xlu2 %556 }
 0x5a3   :  { %v559_v50 = vmul.f32 %v557_v49, %v553_v48 }
 0x5a5   :  { %561 = vrot.lane.b32.xlu2 %v559_v50, %s1958_s14 }
 0x5ae   :  { %v334_v53 = vpop.permute.xlu0 %333 }
 0x5af   :  { %v336_v54 = vmul.f32 %v334_v53, %v330_v52 }
 0x5b1   :  { %338 = vrot.lane.b32.xlu0 %v336_v54, %s1958_s14 }
 0x5b4   :  { %v443_v58 = vpop.permute.xlu1 %442 }
 0x5b5   :  { %v445_v59 = vmul.f32 %v443_v58, %v439_v56 }
 0x5b7   :  { %447 = vrot.lane.b32.xlu1 %v445_v59, %s1958_s14 }
 0x5ff   :  { %v562_v62 = vpop.permute.xlu2 %561 }
 0x600   :  { %v2186_v11 = vadd.f32 %v562_v62, %v554_v60 }
 0x602   :  { %1722 = vtanh.f32 %v2186_v11 }
 0x608   :  { %v1723_v12 = vpop.eup %1722 }
 0x609   :  { %567 = vrot.lane.b32.xlu2 %v1723_v12, %s1957_s13 }
 0x623   :  { %v339_v13 = vpop.permute.xlu0 %338 }
 0x624   :  { %v2190_v18 = vadd.f32 %v339_v13, %v331_v6 }
 0x626   :  { %1724 = vtanh.f32 %v2190_v18 }
 0x629   :  { %v448_v20 = vpop.permute.xlu1 %447 }
 0x62a   :  { %v2194_v21 = vadd.f32 %v448_v20, %v440_v19 }
 0x62c   :  { %v1725_v61 = vpop.eup %1724  ;;  %1726 = vtanh.f32 %v2194_v21 }
 0x62d   :  { %344 = vrot.lane.b32.xlu0 %v1725_v61, %s1957_s13 }
 0x632   :  { %v1727_v31 = vpop.eup %1726 }
 0x633   :  { %453 = vrot.lane.b32.xlu1 %v1727_v31, %s1957_s13 }
 0x663   :  { %v568_v32 = vpop.permute.xlu2 %567 }
 0x664   :  { %v570_v33 = vmul.f32 %v568_v32, %v553_v48 }
 0x666   :  { %592 = vrot.lane.b32.xlu2 %v570_v33, %s1958_s14 }
 0x69f   :  { %v345_v34 = vpop.permute.xlu0 %344 }
 0x6a0   :  { %v2200_v35 = vmul.f32 %v345_v34, %v330_v52 }
 0x6a2   :  { %458 = vrot.lane.b32.xlu0 %v2200_v35, %s1958_s14 }
 0x6a5   :  { %v454_v57 = vpop.permute.xlu1 %453 }
 0x6a6   :  { %v456_v36 = vmul.f32 %v454_v57, %v439_v56 }
 0x6a8   :  { %483 = vrot.lane.b32.xlu1 %v456_v36, %s1958_s14 }
 0x6aa   :  { %136 = vperm.xlu0 %1695, %v2014_v3  }
 0x6c0   :  { %v593_v40 = vpop.permute.xlu2 %592 }
 0x714   :  { %v459_v38 = vpop.permute.xlu0 %458 }
 0x715   :  { %1642 = vmatmul.msk.f32.vlgmr.msra.gmra.mxu0 %vm165_vm0, %v459_v38 }
 0x716   :  { %763 = vmatpush.msra.mxu0 %v2040_v23 }
 0x718   :  { %764 = vmatpush.msra.mxu0 %v2042_v24 }
 0x71a   :  { %v484_v39 = vpop.permute.xlu1 %483  ;;  %765 = vmatpush.msra.mxu0 %v2049_v27 }
 0x71b   :  { %1643 = vmatmul.msk.f32.vlgmr.msra.gmra.mxu1 %vm165_vm0, %v484_v39  ;;  %1645 = vmatmul.msk.f32.vlgmr.msra.gmra.mxu3 %vm165_vm0, %v484_v39 }
 0x71c   :  { %766 = vmatpush.msra.mxu0 %v2055_v29  ;;  %788 = vmatpush.msra.mxu1 %v2045_v25  ;;  %v137_v46 = vpop.permute.xlu0 %136 }
 0x71d   :  { %1646 = vmatmul.msk.f32.vlgmr.msrb.gmra.mxu0 %vm165_vm0, %v593_v40  ;;  %859 = vmatpush.msra.mxu3 %v2125_v14  ;;  %v139_v50 = vmul.f32 %v2025_v7, %v137_v46 }
 0x71e   :  { %902 = vmatpush.msrb.mxu0 %v2009_v1  ;;  %789 = vmatpush.msra.mxu1 %v2047_v26 }
 0x71f   :  { %860 = vmatpush.msra.mxu3 %v2127_v15  ;;  %v140_v53 = vadd.f32 %v2031_v10, %v139_v50 }
 0x720   :  { %903 = vmatpush.msrb.mxu0 %v2011_v2  ;;  %790 = vmatpush.msra.mxu1 %v2053_v28 }
 0x721   :  { %861 = vmatpush.msra.mxu3 %v2131_v16 }
 0x722   :  { %904 = vmatpush.msrb.mxu0 %v2016_v4  ;;  %791 = vmatpush.msra.mxu1 %v2059_v30 }
 0x723   :  { %1649 = vmatmul.msk.f32.vlgmr.msrb.gmra.mxu3 %vm165_vm0, %v593_v40 }
 0x724   :  { %905 = vmatpush.msrb.mxu0 %v2020_v5  ;;  %862 = vmatpush.msra.mxu3 %v2135_v17 }
 0x726   :  { %1014 = vmatpush.msrb.mxu3 %v2102_v63 }
 0x728   :  { %1015 = vmatpush.msrb.mxu3 %v2104_v0 }
 0x72a   :  { %1016 = vmatpush.msrb.mxu3 %v2107_v8 }
 0x72c   :  { %1017 = vmatpush.msrb.mxu3 %v2110_v9 }
 0x792   :  { %v479_v42 = vpop.f32.mrf.mxu0 }
 0x798   :  { %v504_v43 = vpop.f32.mrf.mxu1 }
 0x799   :  { %v505_v44 = vadd.f32 %v504_v43, %v479_v42 }
 0x79a   :  { %v613_v47 = vpop.f32.mrf.mxu0 }
 0x79b   :  { %v507_v45 = vadd.f32 %v2173_v22, %v505_v44 }
 0x79d   :  { %1728 = vtanh.f32 %v507_v45 }
 0x79e   :  { %v588_v48 = vpop.f32.mrf.mxu3 }
 0x79f   :  { %v614_v49 = vadd.f32 %v613_v47, %v588_v48  ;;  %v348_v47 = vmax.f32 %v2200_v35, 0.0 }
 0x7a1   :  { %v616_v51 = vadd.f32 %v2086_v41, %v614_v49 }
 0x7a3   :  { %v1729_v52 = vpop.eup %1728  ;;  %1730 = vtanh.f32 %v616_v51 }
 0x7a4   :  { %513 = vrot.lane.b32.xlu1 %v1729_v52, %s1957_s13  ;;  %v509_v6 = vmul.f32 0.5, %v1729_v52 }
 0x7a6   :  { %v727_v54 = vpop.f32.mrf.mxu3  ;;  %v510_v13 = vadd.f32 0.5, %v509_v6 }
 0x7a7   :  { %v730_v55 = vadd.f32 %v727_v54, %v140_v53  ;;  %v1962_v54 = vmov 4  }
 0x7a8   :  { %v511_v34 = vmul.f32 %v510_v13, %v2190_v18  ;;  %1696 = vset.pattern.permute.xlu2 %v1962_v54 }
 0x7a9   :  { %v1731_v56 = vpop.eup %1730  ;;  %1732 = vtanh.f32 %v730_v55 }
 0x7aa   :  { %622 = vrot.lane.b32.xlu2 %v1731_v56, %s1957_s13  ;;  %v618_v59 = vmul.f32 0.5, %v1731_v56 }
 0x7ac   :  { %v619_v60 = vadd.f32 0.5, %v618_v59 }
 0x7ae   :  { %v620_v37 = vmul.f32 %v619_v60, %v2194_v21 }
 0x7af   :  { %v1733_v58 = vpop.eup %1732 }
 0x7b0   :  { %736 = vrot.lane.b32.xlu1 %v1733_v58, %s1957_s13  ;;  %v732_v61 = vmul.f32 0.5, %v1733_v58 }
 0x7b2   :  { %v733_v31 = vadd.f32 0.5, %v732_v61 }
 0x7b4   :  { %v734_v18 = vmul.f32 %v733_v31, %v2186_v11 }
 0x804   :  { %v623_v62 = vpop.permute.xlu2 %622 }
 0x805   :  { %v625_v12 = vmul.f32 %v623_v62, %v619_v60 }
 0x807   :  { %627 = vrot.lane.b32.xlu0 %v625_v12, %s1958_s14 }
 0x816   :  { %v514_v19 = vpop.permute.xlu1 %513 }
 0x817   :  { %v516_v20 = vmul.f32 %v514_v19, %v510_v13 }
 0x819   :  { %518 = vrot.lane.b32.xlu2 %v516_v20, %s1958_s14 }
 0x822   :  { %v737_v32 = vpop.permute.xlu1 %736 }
 0x823   :  { %v739_v33 = vmul.f32 %v737_v32, %v733_v31 }
 0x825   :  { %741 = vrot.lane.b32.xlu1 %v739_v33, %s1958_s14 }
 0x873   :  { %v519_v57 = vpop.permute.xlu2 %518 }
 0x874   :  { %v2242_v36 = vadd.f32 %v519_v57, %v511_v34 }
 0x876   :  { %1734 = vtanh.f32 %v2242_v36 }
 0x879   :  { %v628_v38 = vpop.permute.xlu0 %627 }
 0x87a   :  { %v2246_v39 = vadd.f32 %v628_v38, %v620_v37 }
 0x87c   :  { %v1735_v40 = vpop.eup %1734  ;;  %1736 = vtanh.f32 %v2246_v39 }
 0x87d   :  { %524 = vrot.lane.b32.xlu2 %v1735_v40, %s1957_s13 }
 0x882   :  { %v1737_v42 = vpop.eup %1736 }
 0x883   :  { %633 = vrot.lane.b32.xlu0 %v1737_v42, %s1957_s13 }
 0x897   :  { %v742_v43 = vpop.permute.xlu1 %741 }
 0x898   :  { %v2252_v44 = vadd.f32 %v742_v43, %v734_v18 }
 0x89a   :  { %1738 = vtanh.f32 %v2252_v44 }
 0x8a0   :  { %v1739_v45 = vpop.eup %1738 }
 0x8a1   :  { %747 = vrot.lane.b32.xlu1 %v1739_v45, %s1957_s13 }
 0x8d7   :  { %v525_v21 = vpop.permute.xlu2 %524 }
 0x8d8   :  { %v527_v46 = vmul.f32 %v525_v21, %v510_v13 }
 0x8da   :  { %v528_v48 = vmax.f32 %v527_v46, 0.0  ;;  %638 = vrot.lane.b32.xlu2 %v527_v46, %s1958_s14 }
 0x8dc   :  { %v2258_v49 = vadd.f32 %v528_v48, %v348_v47 }
 0x8e2   :  { %142 = vperm.xlu2 %1696, %v2014_v3  }
 0x8f5   :  { %v634_v50 = vpop.permute.xlu0 %633 }
 0x8f6   :  { %v636_v51 = vmul.f32 %v634_v50, %v619_v60 }
 0x8f8   :  { %663 = vrot.lane.b32.xlu0 %v636_v51, %s1958_s14 }
 0x913   :  { %v748_v11 = vpop.permute.xlu1 %747 }
 0x914   :  { %v750_v52 = vmul.f32 %v748_v11, %v733_v31 }
 0x916   :  { %772 = vrot.lane.b32.xlu1 %v750_v52, %s1958_s14 }
 0x934   :  { %v639_v53 = vpop.permute.xlu2 %638 }
 0x935   :  { %1647 = vmatmul.msk.f32.vlgmr.msrb.gmra.mxu1 %vm165_vm0, %v639_v53 }
 0x936   :  { %943 = vmatpush.msrb.mxu1 %v2040_v23 }
 0x938   :  { %944 = vmatpush.msrb.mxu1 %v2042_v24 }
 0x93a   :  { %945 = vmatpush.msrb.mxu1 %v2049_v27 }
 0x93c   :  { %946 = vmatpush.msrb.mxu1 %v2055_v29  ;;  %v143_v12 = vpop.permute.xlu2 %142 }
 0x93d   :  { %v145_v13 = vmul.f32 %v2025_v7, %v143_v12 }
 0x93f   :  { %v146_v19 = vadd.f32 %v2031_v10, %v145_v13 }
 0x96a   :  { %v664_v35 = vpop.permute.xlu0 %663 }
 0x96b   :  { %1648 = vmatmul.msk.f32.vlgmr.msrb.gmra.mxu2 %vm165_vm0, %v664_v35  ;;  %1650 = vmatmul.msk.f32.vlgmr.msra.gmra.mxu0 %vm165_vm0, %v664_v35 }
 0x96c   :  { %968 = vmatpush.msrb.mxu2 %v2045_v25  ;;  %1039 = vmatpush.msra.mxu0 %v2125_v14 }
 0x96e   :  { %969 = vmatpush.msrb.mxu2 %v2047_v26  ;;  %1040 = vmatpush.msra.mxu0 %v2127_v15 }
 0x970   :  { %970 = vmatpush.msrb.mxu2 %v2053_v28  ;;  %1041 = vmatpush.msra.mxu0 %v2131_v16 }
 0x972   :  { %971 = vmatpush.msrb.mxu2 %v2059_v30  ;;  %1042 = vmatpush.msra.mxu0 %v2135_v17 }
 0x988   :  { %v773_v55 = vpop.permute.xlu1 %772 }
 0x989   :  { %1651 = vmatmul.msk.f32.vlgmr.msra.gmra.mxu1 %vm165_vm0, %v773_v55  ;;  %1654 = vmatmul.msk.f32.vlgmr.msrb.gmra.mxu0 %vm165_vm0, %v773_v55 }
 0x98a   :  { %1082 = vmatpush.msra.mxu1 %v2009_v1  ;;  %1194 = vmatpush.msrb.mxu0 %v2102_v63 }
 0x98c   :  { %1083 = vmatpush.msra.mxu1 %v2011_v2  ;;  %1195 = vmatpush.msrb.mxu0 %v2104_v0 }
 0x98e   :  { %1084 = vmatpush.msra.mxu1 %v2016_v4  ;;  %1196 = vmatpush.msrb.mxu0 %v2107_v8 }
 0x990   :  { %1085 = vmatpush.msra.mxu1 %v2020_v5  ;;  %1197 = vmatpush.msrb.mxu0 %v2110_v9 }
 0x9b2   :  { %v659_v56 = vpop.f32.mrf.mxu1 }
 0x9e8   :  { %v768_v6 = vpop.f32.mrf.mxu0 }
 0x9ee   :  { %v684_v58 = vpop.f32.mrf.mxu2 }
 0x9ef   :  { %v685_v59 = vadd.f32 %v684_v58, %v659_v56 }
 0x9f1   :  { %v687_v60 = vadd.f32 %v2173_v22, %v685_v59 }
 0x9f3   :  { %1740 = vtanh.f32 %v687_v60 }
 0x9f9   :  { %v1741_v62 = vpop.eup %1740 }
 0x9fa   :  { %693 = vrot.lane.b32.xlu0 %v1741_v62, %s1957_s13  ;;  %v689_v38 = vmul.f32 0.5, %v1741_v62 }
 0x9fc   :  { %v690_v43 = vadd.f32 0.5, %v689_v38 }
 0x9fe   :  { %v691_v35 = vmul.f32 %v690_v43, %v2242_v36 }
 0xa06   :  { %v793_v20 = vpop.f32.mrf.mxu1  ;;  %v907_v61 = vpop.f32.mrf.mxu0 }
 0xa07   :  { %v794_v31 = vadd.f32 %v793_v20, %v768_v6  ;;  %v910_v32 = vadd.f32 %v907_v61, %v146_v19 }
 0xa09   :  { %v796_v33 = vadd.f32 %v2086_v41, %v794_v31  ;;  %1742 = vtanh.f32 %v910_v32  ;;  %v1963_v31 = vmov 5  }
 0xa0a   :  { %1697 = vset.pattern.permute.xlu0 %v1963_v31 }
 0xa0b   :  { %1744 = vtanh.f32 %v796_v33 }
 0xa0f   :  { %v1743_v34 = vpop.eup %1742 }
 0xa10   :  { %916 = vrot.lane.b32.xlu2 %v1743_v34, %s1957_s13  ;;  %v912_v37 = vmul.f32 0.5, %v1743_v34 }
 0xa11   :  { %v1745_v57 = vpop.eup %1744 }
 0xa12   :  { %802 = vrot.lane.b32.xlu1 %v1745_v57, %s1957_s13  ;;  %v913_v40 = vadd.f32 0.5, %v912_v37  ;;  %v798_v46 = vmul.f32 0.5, %v1745_v57 }
 0xa14   :  { %v799_v47 = vadd.f32 0.5, %v798_v46  ;;  %v914_v51 = vmul.f32 %v913_v40, %v2252_v44 }
 0xa16   :  { %v800_v44 = vmul.f32 %v799_v47, %v2246_v39 }
 0xa6a   :  { %v917_v42 = vpop.permute.xlu2 %916 }
 0xa6b   :  { %v919_v18 = vmul.f32 %v917_v42, %v913_v40 }
 0xa6c   :  { %v694_v45 = vpop.permute.xlu0 %693 }
 0xa6d   :  { %v696_v21 = vmul.f32 %v694_v45, %v690_v43  ;;  %921 = vrot.lane.b32.xlu2 %v919_v18, %s1958_s14 }
 0xa6f   :  { %698 = vrot.lane.b32.xlu0 %v696_v21, %s1958_s14 }
 0xa84   :  { %v803_v48 = vpop.permute.xlu1 %802 }
 0xa85   :  { %v805_v50 = vmul.f32 %v803_v48, %v799_v47 }
 0xa87   :  { %807 = vrot.lane.b32.xlu1 %v805_v50, %s1958_s14 }
 0xac7   :  { %v922_v11 = vpop.permute.xlu2 %921 }
 0xac8   :  { %v2299_v52 = vadd.f32 %v922_v11, %v914_v51 }
 0xaca   :  { %1746 = vtanh.f32 %v2299_v52 }
 0xad0   :  { %v1747_v53 = vpop.eup %1746 }
 0xad1   :  { %927 = vrot.lane.b32.xlu2 %v1747_v53, %s1957_s13 }
 0xae1   :  { %v699_v54 = vpop.permute.xlu0 %698 }
 0xae2   :  { %v2304_v55 = vadd.f32 %v699_v54, %v691_v35 }
 0xae4   :  { %1748 = vtanh.f32 %v2304_v55 }
 0xaea   :  { %v1749_v56 = vpop.eup %1748 }
 0xaeb   :  { %704 = vrot.lane.b32.xlu0 %v1749_v56, %s1957_s13 }
 0xaf9   :  { %v808_v58 = vpop.permute.xlu1 %807 }
 0xafa   :  { %v2309_v59 = vadd.f32 %v808_v58, %v800_v44 }
 0xafc   :  { %1750 = vtanh.f32 %v2309_v59 }
 0xb02   :  { %v1751_v60 = vpop.eup %1750 }
 0xb03   :  { %813 = vrot.lane.b32.xlu1 %v1751_v60, %s1957_s13 }
 0xb2b   :  { %v928_v62 = vpop.permute.xlu2 %927 }
 0xb2c   :  { %v930_v36 = vmul.f32 %v928_v62, %v913_v40 }
 0xb2e   :  { %952 = vrot.lane.b32.xlu2 %v930_v36, %s1958_s14 }
 0xb5d   :  { %v705_v12 = vpop.permute.xlu0 %704 }
 0xb5e   :  { %v707_v6 = vmul.f32 %v705_v12, %v690_v43 }
 0xb60   :  { %v708_v13 = vmax.f32 %v707_v6, 0.0  ;;  %818 = vrot.lane.b32.xlu0 %v707_v6, %s1958_s14 }
 0xb62   :  { %v2316_v19 = vadd.f32 %v708_v13, %v2258_v49 }
 0xb68   :  { %148 = vperm.xlu0 %1697, %v2014_v3  }
 0xb75   :  { %v814_v39 = vpop.permute.xlu1 %813 }
 0xb76   :  { %v816_v20 = vmul.f32 %v814_v39, %v799_v47 }
 0xb78   :  { %843 = vrot.lane.b32.xlu1 %v816_v20, %s1958_s14 }
 0xb88   :  { %v953_v32 = vpop.permute.xlu2 %952 }
 0xbd2   :  { %v819_v61 = vpop.permute.xlu0 %818 }
 0xbd3   :  { %1652 = vmatmul.msk.f32.vlgmr.msra.gmra.mxu2 %vm165_vm0, %v819_v61 }
 0xbd4   :  { %1123 = vmatpush.msra.mxu2 %v2040_v23 }
 0xbd6   :  { %1124 = vmatpush.msra.mxu2 %v2042_v24 }
 0xbd8   :  { %1125 = vmatpush.msra.mxu2 %v2049_v27 }
 0xbda   :  { %1126 = vmatpush.msra.mxu2 %v2055_v29  ;;  %v149_v33 = vpop.permute.xlu0 %148 }
 0xbdb   :  { %1656 = vmatmul.msk.f32.vlgmr.msrb.gmra.mxu2 %vm165_vm0, %v953_v32  ;;  %v151_v57 = vmul.f32 %v2025_v7, %v149_v33 }
 0xbdc   :  { %1262 = vmatpush.msrb.mxu2 %v2009_v1 }
 0xbdd   :  { %v152_v42 = vadd.f32 %v2031_v10, %v151_v57 }
 0xbde   :  { %1263 = vmatpush.msrb.mxu2 %v2011_v2 }
 0xbe0   :  { %1264 = vmatpush.msrb.mxu2 %v2016_v4 }
 0xbe2   :  { %1265 = vmatpush.msrb.mxu2 %v2020_v5 }
 0xbea   :  { %v844_v49 = vpop.permute.xlu1 %843 }
 0xbeb   :  { %1653 = vmatmul.msk.f32.vlgmr.msra.gmra.mxu3 %vm165_vm0, %v844_v49  ;;  %1655 = vmatmul.msk.f32.vlgmr.msrb.gmra.mxu1 %vm165_vm0, %v844_v49 }
 0xbec   :  { %1148 = vmatpush.msra.mxu3 %v2045_v25  ;;  %1219 = vmatpush.msrb.mxu1 %v2125_v14 }
 0xbee   :  { %1149 = vmatpush.msra.mxu3 %v2047_v26  ;;  %1220 = vmatpush.msrb.mxu1 %v2127_v15 }
 0xbf0   :  { %1150 = vmatpush.msra.mxu3 %v2053_v28  ;;  %1221 = vmatpush.msrb.mxu1 %v2131_v16 }
 0xbf2   :  { %1151 = vmatpush.msra.mxu3 %v2059_v30  ;;  %1222 = vmatpush.msrb.mxu1 %v2135_v17 }
 0xbf3   :  { %1659 = vmatmul.msk.f32.vlgmr.msra.gmra.mxu1 %vm165_vm0, %v953_v32 }
 0xbf4   :  { %1374 = vmatpush.msra.mxu1 %v2102_v63 }
 0xbf6   :  { %1375 = vmatpush.msra.mxu1 %v2104_v0 }
 0xbf8   :  { %1376 = vmatpush.msra.mxu1 %v2107_v8 }
 0xbfa   :  { %1377 = vmatpush.msra.mxu1 %v2110_v9 }
 0xc56   :  { %v839_v1 = vpop.f32.mrf.mxu2 }
 0xc5e   :  { %v973_v2 = vpop.f32.mrf.mxu2 }
 0xc68   :  { %v948_v3 = vpop.f32.mrf.mxu1 }
 0xc69   :  { %v974_v4 = vadd.f32 %v973_v2, %v948_v3 }
 0xc6b   :  { %v976_v5 = vadd.f32 %v2086_v41, %v974_v4 }
 0xc6d   :  { %1752 = vtanh.f32 %v976_v5 }
 0xc6e   :  { %v864_v34 = vpop.f32.mrf.mxu3 }
 0xc6f   :  { %v865_v37 = vadd.f32 %v864_v34, %v839_v1 }
 0xc70   :  { %v1087_v18 = vpop.f32.mrf.mxu1 }
 0xc71   :  { %v867_v38 = vadd.f32 %v2173_v22, %v865_v37  ;;  %v1090_v43 = vadd.f32 %v1087_v18, %v152_v42 }
 0xc73   :  { %v1753_v40 = vpop.eup %1752  ;;  %1754 = vtanh.f32 %v867_v38 }
 0xc74   :  { %982 = vrot.lane.b32.xlu2 %v1753_v40, %s1957_s13  ;;  %1756 = vtanh.f32 %v1090_v43  ;;  %v978_v46 = vmul.f32 0.5, %v1753_v40 }
 0xc76   :  { %v979_v7 = vadd.f32 0.5, %v978_v46 }
 0xc78   :  { %v980_v44 = vmul.f32 %v979_v7, %v2309_v59 }
 0xc79   :  { %v1755_v45 = vpop.eup %1754 }
 0xc7a   :  { %873 = vrot.lane.b32.xlu1 %v1755_v45, %s1957_s13  ;;  %v1757_v21 = vpop.eup %1756  ;;  %v869_v50 = vmul.f32 0.5, %v1755_v45 }
 0xc7b   :  { %v1092_v53 = vmul.f32 0.5, %v1757_v21 }
 0xc7c   :  { %v870_v51 = vadd.f32 0.5, %v869_v50 }
 0xc7d   :  { %v1093_v35 = vadd.f32 0.5, %v1092_v53 }
 0xc7e   :  { %v871_v62 = vmul.f32 %v870_v51, %v2304_v55 }
 0xc7f   :  { %v1094_v59 = vmul.f32 %v1093_v35, %v2299_v52 }
 0xc82   :  { %1096 = vrot.lane.b32.xlu1 %v1757_v21, %s1957_s13 }
 0xcce   :  { %v983_v47 = vpop.permute.xlu2 %982 }
 0xccf   :  { %v985_v48 = vmul.f32 %v983_v47, %v979_v7 }
 0xcd1   :  { %987 = vrot.lane.b32.xlu0 %v985_v48, %s1958_s14 }
 0xcec   :  { %v874_v10 = vpop.permute.xlu1 %873 }
 0xced   :  { %v876_v11 = vmul.f32 %v874_v10, %v870_v51 }
 0xcef   :  { %878 = vrot.lane.b32.xlu2 %v876_v11, %s1958_s14 }
 0xcf4   :  { %v1097_v54 = vpop.permute.xlu1 %1096 }
 0xcf5   :  { %v1099_v56 = vmul.f32 %v1097_v54, %v1093_v35 }
 0xcf7   :  { %1101 = vrot.lane.b32.xlu1 %v1099_v56, %s1958_s14 }
 0xd43   :  { %v988_v58 = vpop.permute.xlu0 %987 }
 0xd44   :  { %v2356_v60 = vadd.f32 %v988_v58, %v980_v44 }
 0xd46   :  { %1758 = vtanh.f32 %v2356_v60 }
 0xd49   :  { %v879_v36 = vpop.permute.xlu2 %878 }
 0xd4a   :  { %v2360_v12 = vadd.f32 %v879_v36, %v871_v62 }
 0xd4c   :  { %v1759_v6 = vpop.eup %1758  ;;  %1760 = vtanh.f32 %v2360_v12 }
 0xd4d   :  { %993 = vrot.lane.b32.xlu0 %v1759_v6, %s1957_s13 }
 0xd52   :  { %v1761_v13 = vpop.eup %1760 }
 0xd53   :  { %884 = vrot.lane.b32.xlu2 %v1761_v13, %s1957_s13 }
 0xd69   :  { %v1102_v39 = vpop.permute.xlu1 %1101 }
 0xd6a   :  { %v2366_v20 = vadd.f32 %v1102_v39, %v1094_v59 }
 0xd6c   :  { %1762 = vtanh.f32 %v2366_v20 }
 0xd72   :  { %v1763_v61 = vpop.eup %1762 }
 0xd73   :  { %1107 = vrot.lane.b32.xlu1 %v1763_v61, %s1957_s13 }
 0xdad   :  { %v885_v55 = vpop.permute.xlu2 %884 }
 0xdae   :  { %v887_v31 = vmul.f32 %v885_v55, %v870_v51 }
 0xdb0   :  { %v888_v32 = vmax.f32 %v887_v31, 0.0  ;;  %998 = vrot.lane.b32.xlu2 %v887_v31, %s1958_s14 }
 0xdb2   :  { %v2372_v49 = vadd.f32 %v888_v32, %v2316_v19 }
 0xdbf   :  { %v994_v1 = vpop.permute.xlu0 %993 }
 0xdc0   :  { %v996_v2 = vmul.f32 %v994_v1, %v979_v7 }
 0xdc2   :  { %1023 = vrot.lane.b32.xlu0 %v996_v2, %s1958_s14 }
 0xde5   :  { %v1108_v52 = vpop.permute.xlu1 %1107 }
 0xde6   :  { %v1110_v3 = vmul.f32 %v1108_v52, %v1093_v35  ;;  %v1807_v52 = vld [vmem:[#allocation8 + $0x38] sm:$0xff] }
 0xde8   :  { %1132 = vrot.lane.b32.xlu1 %v1110_v3, %s1958_s14  ;;  %v1808_v3 = vld [vmem:[#allocation8 + $0x30] sm:$0xff] }
 0xe0a   :  { %v999_v4 = vpop.permute.xlu2 %998 }
 0xe0b   :  { %1657 = vmatmul.msk.f32.vlgmr.msrb.gmra.mxu3 %vm165_vm0, %v999_v4  ;;  %v1809_v4 = vld [vmem:[#allocation8 + $0x28] sm:$0xff] }
 0xe0c   :  { %1303 = vmatpush.msrb.mxu3 %v2040_v23  ;;  %v1964_v23 = vmov 6  }
 0xe0d   :  { %1698 = vset.pattern.permute.xlu2 %v1964_v23  ;;  %v1810_v23 = vld [vmem:[#allocation8 + $0x20] sm:$0xff] }
 0xe0e   :  { %1304 = vmatpush.msrb.mxu3 %v2042_v24  ;;  %v2390_v24 = vld [vmem:[#allocation2] sm:$0x3] }
 0xe0f   :  { %154 = vperm.xlu2 %1698, %v2390_v24  }
 0xe10   :  { %1305 = vmatpush.msrb.mxu3 %v2049_v27  ;;  %v1802_v27 = vld [vmem:[#allocation8 + $0x10] sm:$0xff] }
 0xe12   :  { %1306 = vmatpush.msrb.mxu3 %v2055_v29  ;;  %v1804_v29 = vld [vmem:[#allocation8] sm:$0xff] }
 0xe34   :  { %v1024_v19 = vpop.permute.xlu0 %1023 }
 0xe35   :  { %1658 = vmatmul.msk.f32.vlgmr.msra.gmra.mxu0 %vm165_vm0, %v1024_v19  ;;  %1660 = vmatmul.msk.f32.vlgmr.msra.gmra.mxu2 %vm165_vm0, %v1024_v19 }
 0xe36   :  { %1328 = vmatpush.msra.mxu0 %v2045_v25  ;;  %1399 = vmatpush.msra.mxu2 %v2125_v14 }
 0xe38   :  { %1329 = vmatpush.msra.mxu0 %v2047_v26  ;;  %1400 = vmatpush.msra.mxu2 %v2127_v15  ;;  %v1801_v26 = vld [vmem:[#allocation8 + $0x18] sm:$0xff] }
 0xe3a   :  { %1330 = vmatpush.msra.mxu0 %v2053_v28  ;;  %1401 = vmatpush.msra.mxu2 %v2131_v16  ;;  %v1803_v28 = vld [vmem:[#allocation8 + $0x8] sm:$0xff] }
 0xe3c   :  { %1331 = vmatpush.msra.mxu0 %v2059_v30  ;;  %1402 = vmatpush.msra.mxu2 %v2135_v17 }
 0xe5a   :  { %v1133_v25 = vpop.permute.xlu1 %1132 }
 0xe5b   :  { %1661 = vmatmul.msk.f32.vlgmr.msra.gmra.mxu3 %vm165_vm0, %v1133_v25  ;;  %1664 = vmatmul.msk.f32.vlgmr.msrb.gmra.mxu2 %vm165_vm0, %v1133_v25 }
 0xe5c   :  { %1442 = vmatpush.msra.mxu3 %v1801_v26  ;;  %1554 = vmatpush.msrb.mxu2 %v2102_v63  ;;  %v1811_v26 = vld [vmem:[#allocation7 + $0x18] sm:$0xff] }
 0xe5e   :  { %1443 = vmatpush.msra.mxu3 %v1802_v27  ;;  %1555 = vmatpush.msrb.mxu2 %v2104_v0  ;;  %v2402_v0 = vld [vmem:[#allocation5] ss:$0 sm:$0xff] }
 0xe5f   :  { %v1812_v27 = vld [vmem:[#allocation7 + $0x38] sm:$0xff] }
 0xe60   :  { %1444 = vmatpush.msra.mxu3 %v1803_v28  ;;  %1556 = vmatpush.msrb.mxu2 %v2107_v8  ;;  %v2408_v8 = vld [vmem:[%s2498_s4] ss:$0 sm:$0xff]  ;;  %v1813_v28 = vld [vmem:[#allocation7 + $0x10] sm:$0xff] }
 0xe62   :  { %1445 = vmatpush.msra.mxu3 %v1804_v29  ;;  %1557 = vmatpush.msrb.mxu2 %v2110_v9  ;;  %v1814_v29 = vld [vmem:[#allocation7 + $0x30] sm:$0xff] }
 0xe69   :  { %v155_v63 = vpop.permute.xlu2 %154 }
 0xe6a   :  { %v157_v33 = vmul.f32 %v2402_v0, %v155_v63 }
 0xe6c   :  { %v158_v9 = vadd.f32 %v2408_v8, %v157_v33 }
 0xe8e   :  { %v1019_v30 = vpop.f32.mrf.mxu3 }
 0xeb2   :  { %v1044_v14 = vpop.f32.mrf.mxu0 }
 0xeb3   :  { %v1045_v15 = vadd.f32 %v1044_v14, %v1019_v30  ;;  %v1815_v30 = vld [vmem:[#allocation7 + $0x8] sm:$0xff] }
 0xeb4   :  { %v1816_v14 = vld [vmem:[#allocation7 + $0x28] sm:$0xff] }
 0xeb5   :  { %v1047_v16 = vadd.f32 %v2173_v22, %v1045_v15  ;;  %v1817_v15 = vld [vmem:[#allocation7] sm:$0xff] }
 0xeb7   :  { %1764 = vtanh.f32 %v1047_v16 }
 0xeb8   :  { %v1128_v5 = vpop.f32.mrf.mxu2 }
 0xebd   :  { %v1765_v17 = vpop.eup %1764 }
 0xebe   :  { %1053 = vrot.lane.b32.xlu0 %v1765_v17, %s1957_s13  ;;  %v1049_v43 = vmul.f32 0.5, %v1765_v17 }
 0xec0   :  { %v1050_v45 = vadd.f32 0.5, %v1049_v43 }
 0xec2   :  { %v1051_v56 = vmul.f32 %v1050_v45, %v2360_v12 }
 0xede   :  { %v1153_v34 = vpop.f32.mrf.mxu3  ;;  %v1267_v57 = vpop.f32.mrf.mxu2 }
 0xedf   :  { %v1154_v37 = vadd.f32 %v1153_v34, %v1128_v5  ;;  %v1270_v38 = vadd.f32 %v1267_v57, %v158_v9 }
 0xee1   :  { %v1156_v40 = vadd.f32 %v2086_v41, %v1154_v37  ;;  %1766 = vtanh.f32 %v1270_v38  ;;  %v2449_v38 = vld [vmem:[%s2498_s4 + $0x1] ss:$0 sm:$0xff] }
 0xee3   :  { %1768 = vtanh.f32 %v1156_v40 }
 0xee7   :  { %v1767_v42 = vpop.eup %1766 }
 0xee8   :  { %1276 = vrot.lane.b32.xlu2 %v1767_v42, %s1957_s13  ;;  %v1272_v7 = vmul.f32 0.5, %v1767_v42 }
 0xee9   :  { %v1769_v18 = vpop.eup %1768 }
 0xeea   :  { %1162 = vrot.lane.b32.xlu1 %v1769_v18, %s1957_s13  ;;  %v1273_v47 = vadd.f32 0.5, %v1272_v7  ;;  %v1158_v41 = vmul.f32 0.5, %v1769_v18 }
 0xeec   :  { %v1159_v51 = vadd.f32 0.5, %v1158_v41  ;;  %v1274_v53 = vmul.f32 %v1273_v47, %v2366_v20 }
 0xeee   :  { %v1160_v6 = vmul.f32 %v1159_v51, %v2356_v60 }
 0xf30   :  { %v1054_v21 = vpop.permute.xlu0 %1053 }
 0xf31   :  { %v1056_v46 = vmul.f32 %v1054_v21, %v1050_v45 }
 0xf33   :  { %1058 = vrot.lane.b32.xlu0 %v1056_v46, %s1958_s14 }
 0xf42   :  { %v1277_v48 = vpop.permute.xlu2 %1276 }
 0xf43   :  { %v1279_v50 = vmul.f32 %v1277_v48, %v1273_v47 }
 0xf45   :  { %1281 = vrot.lane.b32.xlu2 %v1279_v50, %s1958_s14 }
 0xf5c   :  { %v1163_v10 = vpop.permute.xlu1 %1162 }
 0xf5d   :  { %v1165_v11 = vmul.f32 %v1163_v10, %v1159_v51 }
 0xf5f   :  { %1167 = vrot.lane.b32.xlu1 %v1165_v11, %s1958_s14 }
 0xf9f   :  { %v1282_v35 = vpop.permute.xlu2 %1281 }
 0xfa0   :  { %v2418_v54 = vadd.f32 %v1282_v35, %v1274_v53 }
 0xfa2   :  { %1770 = vtanh.f32 %v2418_v54 }
 0xfa5   :  { %v1059_v44 = vpop.permute.xlu0 %1058 }
 0xfa6   :  { %v2422_v58 = vadd.f32 %v1059_v44, %v1051_v56 }
 0xfa8   :  { %v1771_v62 = vpop.eup %1770  ;;  %1772 = vtanh.f32 %v2422_v58 }
 0xfa9   :  { %1287 = vrot.lane.b32.xlu2 %v1771_v62, %s1957_s13 }
 0xfae   :  { %v1773_v36 = vpop.eup %1772 }
 0xfaf   :  { %1064 = vrot.lane.b32.xlu0 %v1773_v36, %s1957_s13 }
 0xfd1   :  { %v1168_v13 = vpop.permute.xlu1 %1167 }
 0xfd2   :  { %v2428_v59 = vadd.f32 %v1168_v13, %v1160_v6 }
 0xfd4   :  { %1774 = vtanh.f32 %v2428_v59 }
 0xfda   :  { %v1775_v39 = vpop.eup %1774 }
 0xfdb   :  { %1173 = vrot.lane.b32.xlu1 %v1775_v39, %s1957_s13 }
0x1003   :  { %v1288_v12 = vpop.permute.xlu2 %1287 }
0x1004   :  { %v1290_v20 = vmul.f32 %v1288_v12, %v1273_v47 }
0x1006   :  { %1312 = vrot.lane.b32.xlu2 %v1290_v20, %s1958_s14 }
0x1021   :  { %v1065_v61 = vpop.permute.xlu0 %1064 }
0x1022   :  { %v1067_v55 = vmul.f32 %v1065_v61, %v1050_v45 }
0x1024   :  { %v1068_v31 = vmax.f32 %v1067_v55, 0.0  ;;  %1178 = vrot.lane.b32.xlu0 %v1067_v55, %s1958_s14 }
0x1026   :  { %v2435_v32 = vadd.f32 %v1068_v31, %v2372_v49  ;;  %v1965_v49 = vmov 7  }
0x1027   :  { %1699 = vset.pattern.permute.xlu0 %v1965_v49 }
0x102c   :  { %160 = vperm.xlu0 %1699, %v2390_v24   ;;  %v1818_v24 = vld [vmem:[#allocation7 + $0x20] sm:$0xff] }
0x104d   :  { %v1174_v60 = vpop.permute.xlu1 %1173 }
0x104e   :  { %v1176_v1 = vmul.f32 %v1174_v60, %v1159_v51 }
0x1050   :  { %1203 = vrot.lane.b32.xlu1 %v1176_v1, %s1958_s14 }
0x1060   :  { %v1313_v19 = vpop.permute.xlu2 %1312 }
0x1096   :  { %v1179_v2 = vpop.permute.xlu0 %1178 }
0x1097   :  { %1662 = vmatmul.msk.f32.vlgmr.msrb.gmra.mxu0 %vm165_vm0, %v1179_v2 }
0x1098   :  { %1483 = vmatpush.msrb.mxu0 %v1807_v52 }
0x109a   :  { %1484 = vmatpush.msrb.mxu0 %v1808_v3 }
0x109c   :  { %1485 = vmatpush.msrb.mxu0 %v1809_v4 }
0x109e   :  { %1486 = vmatpush.msrb.mxu0 %v1810_v23  ;;  %v161_v33 = vpop.permute.xlu0 %160 }
0x109f   :  { %1666 = vmatmul.msk.f32.vlgmr.msra.gmra.mxu0 %vm165_vm0, %v1313_v19  ;;  %v163_v37 = vmul.f32 %v2402_v0, %v161_v33 }
0x10a1   :  { %v164_v18 = vadd.f32 %v2408_v8, %v163_v37 }
0x10c2   :  { %v1204_v25 = vpop.permute.xlu1 %1203 }
0x10c3   :  { %1663 = vmatmul.msk.f32.vlgmr.msrb.gmra.mxu1 %vm165_vm0, %v1204_v25  ;;  %1665 = vmatmul.msk.f32.vlgmr.msrb.gmra.mxu3 %vm165_vm0, %v1204_v25  ;;  %v1820_v25 = vld [vmem:[%s2498_s4 + $0x2] ss:$0 sm:$0xff]  ;;  %s1966_s4 = smov [#allocation10]  }
0x10c4   :  { %1508 = vmatpush.msrb.mxu1 %v1811_v26  ;;  %1579 = vmatpush.msrb.mxu3 %v1812_v27  ;;  %s1621_s25 = sshll.u32 %s1966_s4, 4  ;;  %s1622_s25 = int_to_ptr.vmem [resolvable:$true] %s1621_s25 }
0x10c6   :  { %1509 = vmatpush.msrb.mxu1 %v1813_v28  ;;  %1580 = vmatpush.msrb.mxu3 %v1814_v29 }
0x10c8   :  { %1510 = vmatpush.msrb.mxu1 %v1815_v30  ;;  %1581 = vmatpush.msrb.mxu3 %v1816_v14 }
0x10ca   :  { %1511 = vmatpush.msrb.mxu1 %v1817_v15  ;;  %1582 = vmatpush.msrb.mxu3 %v1818_v24 }
0x10cb   :  { %1669 = vmatmul.msk.f32.vlgmr.msra.gmra.mxu3 %vm165_vm0, %v1313_v19 }
0x1114   :  { %v1199_v16 = vpop.f32.mrf.mxu0 }
0x111c   :  { %v1333_v9 = vpop.f32.mrf.mxu0 }
0x1140   :  { %v1224_v17 = vpop.f32.mrf.mxu1 }
0x1141   :  { %v1225_v63 = vadd.f32 %v1224_v17, %v1199_v16 }
0x1143   :  { %v1227_v5 = vadd.f32 %v2173_v22, %v1225_v63 }
0x1145   :  { %1776 = vtanh.f32 %v1227_v5 }
0x1146   :  { %v1308_v34 = vpop.f32.mrf.mxu3 }
0x1147   :  { %v1334_v57 = vadd.f32 %v1333_v9, %v1308_v34 }
0x1149   :  { %v1336_v40 = vadd.f32 %v2449_v38, %v1334_v57 }
0x114b   :  { %v1777_v42 = vpop.eup %1776  ;;  %1778 = vtanh.f32 %v1336_v40 }
0x114c   :  { %1233 = vrot.lane.b32.xlu1 %v1777_v42, %s1957_s13  ;;  %v1229_v48 = vmul.f32 0.5, %v1777_v42 }
0x114e   :  { %v1447_v22 = vpop.f32.mrf.mxu3  ;;  %v1230_v50 = vadd.f32 0.5, %v1229_v48 }
0x114f   :  { %v1450_v43 = vadd.f32 %v1447_v22, %v164_v18 }
0x1150   :  { %v1231_v35 = vmul.f32 %v1230_v50, %v2422_v58 }
0x1151   :  { %v1779_v45 = vpop.eup %1778  ;;  %1780 = vtanh.f32 %v1450_v43 }
0x1152   :  { %1342 = vrot.lane.b32.xlu2 %v1779_v45, %s1957_s13  ;;  %v1338_v21 = vmul.f32 0.5, %v1779_v45 }
0x1154   :  { %v1339_v46 = vadd.f32 0.5, %v1338_v21 }
0x1156   :  { %v1340_v62 = vmul.f32 %v1339_v46, %v2428_v59 }
0x1157   :  { %v1781_v0 = vpop.eup %1780 }
0x1158   :  { %1456 = vrot.lane.b32.xlu1 %v1781_v0, %s1957_s13  ;;  %v1452_v51 = vmul.f32 0.5, %v1781_v0 }
0x115a   :  { %v1453_v10 = vadd.f32 0.5, %v1452_v51 }
0x115c   :  { %v1454_v12 = vmul.f32 %v1453_v10, %v2418_v54 }
0x11ac   :  { %v1343_v7 = vpop.permute.xlu2 %1342 }
0x11ad   :  { %v1345_v47 = vmul.f32 %v1343_v7, %v1339_v46 }
0x11af   :  { %1347 = vrot.lane.b32.xlu0 %v1345_v47, %s1958_s14 }
0x11be   :  { %v1234_v8 = vpop.permute.xlu1 %1233 }
0x11bf   :  { %v1236_v41 = vmul.f32 %v1234_v8, %v1230_v50 }
0x11c1   :  { %1238 = vrot.lane.b32.xlu2 %v1236_v41, %s1958_s14 }
0x11ca   :  { %v1457_v11 = vpop.permute.xlu1 %1456 }
0x11cb   :  { %v1459_v53 = vmul.f32 %v1457_v11, %v1453_v10 }
0x11cd   :  { %1461 = vrot.lane.b32.xlu1 %v1459_v53, %s1958_s14 }
0x121b   :  { %v1239_v56 = vpop.permute.xlu2 %1238 }
0x121c   :  { %v1241_v44 = vadd.f32 %v1239_v56, %v1231_v35 }
0x121e   :  { %1782 = vtanh.f32 %v1241_v44 }
0x1221   :  { %v1348_v36 = vpop.permute.xlu0 %1347 }
0x1222   :  { %v1350_v6 = vadd.f32 %v1348_v36, %v1340_v62 }
0x1224   :  { %v1783_v13 = vpop.eup %1782  ;;  %1784 = vtanh.f32 %v1350_v6 }
0x1225   :  { %1244 = vrot.lane.b32.xlu2 %v1783_v13, %s1957_s13 }
0x122a   :  { %v1785_v39 = vpop.eup %1784 }
0x122b   :  { %1353 = vrot.lane.b32.xlu0 %v1785_v39, %s1957_s13 }
0x123f   :  { %v1462_v20 = vpop.permute.xlu1 %1461 }
0x1240   :  { %v1464_v61 = vadd.f32 %v1462_v20, %v1454_v12 }
0x1242   :  { %1786 = vtanh.f32 %v1464_v61 }
0x1248   :  { %v1787_v58 = vpop.eup %1786 }
0x1249   :  { %1467 = vrot.lane.b32.xlu1 %v1787_v58, %s1957_s13 }
0x127f   :  { %v1245_v55 = vpop.permute.xlu2 %1244 }
0x1280   :  { %v1247_v31 = vmul.f32 %v1245_v55, %v1230_v50 }
0x1282   :  { %v1248_v59 = vmax.f32 %v1247_v31, 0.0  ;;  %1358 = vrot.lane.b32.xlu2 %v1247_v31, %s1958_s14 }
0x1284   :  { %v1249_v60 = vadd.f32 %v1248_v59, %v2435_v32 }
0x129d   :  { %v1354_v1 = vpop.permute.xlu0 %1353 }
0x129e   :  { %v1356_v2 = vmul.f32 %v1354_v1, %v1339_v46 }
0x12a0   :  { %1383 = vrot.lane.b32.xlu0 %v1356_v2, %s1958_s14 }
0x12bb   :  { %v1468_v52 = vpop.permute.xlu1 %1467 }
0x12bc   :  { %v1470_v3 = vmul.f32 %v1468_v52, %v1453_v10 }
0x12be   :  { %1492 = vrot.lane.b32.xlu1 %v1470_v3, %s1958_s14 }
0x12dc   :  { %v1359_v54 = vpop.permute.xlu2 %1358 }
0x12dd   :  { %1667 = vmatmul.msk.f32.vlgmr.msra.gmra.mxu1 %vm165_vm0, %v1359_v54 }
0x1312   :  { %v1384_v4 = vpop.permute.xlu0 %1383 }
0x1313   :  { %1668 = vmatmul.msk.f32.vlgmr.msra.gmra.mxu2 %vm165_vm0, %v1384_v4  ;;  %1670 = vmatmul.msk.f32.vlgmr.msrb.gmra.mxu0 %vm165_vm0, %v1384_v4 }
0x1330   :  { %v1493_v19 = vpop.permute.xlu1 %1492 }
0x1331   :  { %1671 = vmatmul.msk.f32.vlgmr.msrb.gmra.mxu1 %vm165_vm0, %v1493_v19 }
0x135a   :  { %v1379_v32 = vpop.f32.mrf.mxu1 }
0x1390   :  { %v1488_v28 = vpop.f32.mrf.mxu0 }
0x1396   :  { %v1404_v23 = vpop.f32.mrf.mxu2 }
0x1397   :  { %v1405_v49 = vadd.f32 %v1404_v23, %v1379_v32 }
0x1399   :  { %v1407_v26 = vadd.f32 %v1820_v25, %v1405_v49 }
0x139b   :  { %1788 = vtanh.f32 %v1407_v26 }
0x13a1   :  { %v1789_v27 = vpop.eup %1788 }
0x13a2   :  { %1413 = vrot.lane.b32.xlu2 %v1789_v27, %s1957_s13  ;;  %v1409_v24 = vmul.f32 0.5, %v1789_v27 }
0x13a4   :  { %v1410_v16 = vadd.f32 0.5, %v1409_v24 }
0x13a6   :  { %v1411_v57 = vmul.f32 %v1410_v16, %v1241_v44 }
0x13ae   :  { %v1513_v29 = vpop.f32.mrf.mxu1 }
0x13af   :  { %v1514_v30 = vadd.f32 %v1513_v29, %v1488_v28 }
0x13b1   :  { %v1516_v14 = vadd.f32 %v2449_v38, %v1514_v30 }
0x13b3   :  { %1790 = vtanh.f32 %v1516_v14 }
0x13b9   :  { %v1791_v15 = vpop.eup %1790 }
0x13ba   :  { %1522 = vrot.lane.b32.xlu0 %v1791_v15, %s1957_s13  ;;  %v1518_v5 = vmul.f32 0.5, %v1791_v15 }
0x13bc   :  { %v1519_v33 = vadd.f32 0.5, %v1518_v5 }
0x13be   :  { %v1520_v42 = vmul.f32 %v1519_v33, %v1350_v6 }
0x13fc   :  { %v1414_v17 = vpop.permute.xlu2 %1413 }
0x13fd   :  { %v1416_v63 = vmul.f32 %v1414_v17, %v1410_v16 }
0x13ff   :  { %1418 = vrot.lane.b32.xlu1 %v1416_v63, %s1958_s14 }
0x142c   :  { %v1523_v9 = vpop.permute.xlu0 %1522 }
0x142d   :  { %v1525_v34 = vmul.f32 %v1523_v9, %v1519_v33 }
0x142f   :  { %1527 = vrot.lane.b32.xlu2 %v1525_v34, %s1958_s14 }
0x1471   :  { %v1419_v37 = vpop.permute.xlu1 %1418 }
0x1472   :  { %v1421_v40 = vadd.f32 %v1419_v37, %v1411_v57 }
0x1474   :  { %1792 = vtanh.f32 %v1421_v40 }
0x147a   :  { %v1793_v38 = vpop.eup %1792 }
0x147b   :  { %1424 = vrot.lane.b32.xlu0 %v1793_v38, %s1957_s13 }
0x1489   :  { %v1528_v18 = vpop.permute.xlu2 %1527 }
0x148a   :  { %v1530_v22 = vadd.f32 %v1528_v18, %v1520_v42 }
0x148c   :  { %1794 = vtanh.f32 %v1530_v22 }
0x1492   :  { %v1795_v43 = vpop.eup %1794 }
0x1493   :  { %1533 = vrot.lane.b32.xlu1 %v1795_v43, %s1957_s13 }
0x14ed   :  { %v1425_v45 = vpop.permute.xlu0 %1424 }
0x14ee   :  { %v1427_v0 = vmul.f32 %v1425_v45, %v1410_v16 }
0x14f0   :  { %v1428_v21 = vmax.f32 %v1427_v0, 0.0  ;;  %1538 = vrot.lane.b32.xlu2 %v1427_v0, %s1958_s14 }
0x14f2   :  { %v1429_v46 = vadd.f32 %v1428_v21, %v1249_v60 }
0x1505   :  { %v1534_v7 = vpop.permute.xlu1 %1533 }
0x1506   :  { %v1536_v47 = vmul.f32 %v1534_v7, %v1519_v33 }
0x1508   :  { %1563 = vrot.lane.b32.xlu0 %v1536_v47, %s1958_s14 }
0x154a   :  { %v1539_v48 = vpop.permute.xlu2 %1538 }
0x154b   :  { %1672 = vmatmul.msk.f32.vlgmr.msrb.gmra.mxu2 %vm165_vm0, %v1539_v48 }
0x157a   :  { %v1564_v50 = vpop.permute.xlu0 %1563 }
0x157b   :  { %1673 = vmatmul.msk.f32.vlgmr.msrb.gmra.mxu3 %vm165_vm0, %v1564_v50 }
0x15ce   :  { %v1559_v8 = vpop.f32.mrf.mxu2 }
0x15fe   :  { %v1584_v41 = vpop.f32.mrf.mxu3 }
0x15ff   :  { %v1585_v51 = vadd.f32 %v1584_v41, %v1559_v8 }
0x1601   :  { %v1587_v10 = vadd.f32 %v1820_v25, %v1585_v51 }
0x1603   :  { %1796 = vtanh.f32 %v1587_v10 }
0x1609   :  { %v1797_v11 = vpop.eup %1796 }
0x160a   :  { %1593 = vrot.lane.b32.xlu1 %v1797_v11, %s1957_s13  ;;  %v1589_v53 = vmul.f32 0.5, %v1797_v11 }
0x160c   :  { %v1590_v35 = vadd.f32 0.5, %v1589_v53 }
0x160e   :  { %v1591_v62 = vmul.f32 %v1590_v35, %v1421_v40 }
0x167c   :  { %v1594_v56 = vpop.permute.xlu1 %1593 }
0x167d   :  { %v1596_v44 = vmul.f32 %v1594_v56, %v1590_v35 }
0x167f   :  { %1598 = vrot.lane.b32.xlu2 %v1596_v44, %s1958_s14 }
0x16d9   :  { %v1599_v36 = vpop.permute.xlu2 %1598 }
0x16da   :  { %v1601_v6 = vadd.f32 %v1599_v36, %v1591_v62 }
0x16dc   :  { %1798 = vtanh.f32 %v1601_v6 }
0x16e2   :  { %v1799_v13 = vpop.eup %1798 }
0x16e3   :  { %1604 = vrot.lane.b32.xlu0 %v1799_v13, %s1957_s13 }
0x1755   :  { %v1605_v39 = vpop.permute.xlu0 %1604 }
0x1756   :  { %v1607_v12 = vmul.f32 %v1605_v39, %v1590_v35 }
0x1758   :  { %v1608_v20 = vmax.f32 %v1607_v12, 0.0 }
0x175a   :  { %v1609_v61 = vadd.f32 %v1608_v20, %v1429_v46 }
0x175c   :  { %1611 = vrot.lane.b32.xlu1 %v1609_v61, %s1958_s14 }
0x17ce   :  { %v1612_v58 = vpop.permute.xlu1 %1611 }
0x17cf   :  { %1615 = vst.msk [vmem:[#allocation10] sm:$0x3] %vm1614_vm1, %v1612_v58 }
0x17d0   :  { %1626 = dma.vmem_to_hbm [thread:$0]  %s1622_s25, 32, %s1624_s28, [#allocation4]  }
0x17d1   :  { %1947 = dma.done.wait [#allocation4], 32  }
0x17d2   :  { %1948 = vsyncadd [#allocation4], 4294967264 }
0x17d3   :  { %1631 = vsyncpa [#allocation3], 1 }
0x17d4   :  { %1632 = vsyncpa [#allocation6], 1 }
0x17d5   :  { %1633 = vsyncpa [#allocation9], 1 }
0x17d6   :  { %1634 = vsyncpa [#allocation4], 1 }

</bundles_post_ra>
